<compile_context>
chip_gen: v7x
topology: tpu7x:2x2x1
jax: 0.10.0
libtpu: 0.0.40
codegen_flags: <defaults>
</compile_context>

<pallas_src>
import functools
import math

import jax
import jax.numpy as jnp
from jax.experimental import pallas as pl
from jax.experimental.pallas import tpu as pltpu

CHANNELS = 64            # architecture_specs.fully_connected_units[0]
N_LAYERS = 2             # len(fully_connected_units)
EMB = 2 * CHANNELS       # 128 — hard-coded pis timestep embedding width
NN_CLIP = 10000.0
LGV_CLIP = 100.0
LANE = 128               # TPU lane width


def _act(x):
    # TODO(synk): PyTorch nn.GELU() default is the exact erf form; the tanh
    # approximation is used here because it lowers cleanly on the TPU EUP.
    return jax.nn.gelu(x, approximate=True)


def _round_up(x, m):
    return (x + m - 1) // m * m


def pisgrad_kernel(t_ref, x_ref, g_ref,
                   coeff_ref, phase_ref,
                   ts_w1s, ts_w1c, ts_b1, ts_w2, ts_b2,
                   tg_w0s, tg_w0c, tg_b0, tg_w1, tg_b1, tg_w2, tg_b2, tg_w3, tg_b3,
                   st_w1x, st_w1t, st_b1, st_w2, st_b2, st_w3, st_b3,
                   out_ref):
    dot = functools.partial(jnp.dot, preferred_element_type=jnp.float32)
    bf16 = jnp.bfloat16

    # --- pis timestep embedding (kept f32; sin/cos on EUP) -------------------
    t = t_ref[...]                                        # (TB, 1)
    arg = coeff_ref[...] * t + phase_ref[...]             # (TB, C)
    emb_sin = jnp.sin(arg).astype(bf16)
    emb_cos = jnp.cos(arg).astype(bf16)

    x = x_ref[...]                                        # (TB, DPAD), lane-padded
    grad_val = jnp.clip(g_ref[...], -LGV_CLIP, LGV_CLIP)  # (TB, DPAD)

    # --- time_coder_state:  Linear(128,64) -> act -> Linear(64,64) ----------
    h = _act(dot(emb_sin, ts_w1s[...]) + dot(emb_cos, ts_w1c[...]) + ts_b1[...])
    t_net_1 = dot(h.astype(bf16), ts_w2[...]) + ts_b2[...]           # (TB, C)

    # --- time_coder_grad:  L0 -> [act -> L]*2 -> act -> LinearConsInit ------
    h = dot(emb_sin, tg_w0s[...]) + dot(emb_cos, tg_w0c[...]) + tg_b0[...]
    h = _act(h)
    h = _act(dot(h.astype(bf16), tg_w1[...]) + tg_b1[...])
    h = _act(dot(h.astype(bf16), tg_w2[...]) + tg_b2[...])
    t_net_2 = dot(h.astype(bf16), tg_w3[...]) + tg_b3[...]           # (TB, DPAD)

    # --- state_time_net:  Linear(64+dim,64) -> act -> Linear -> act -> Zero --
    # concat([x, t_net_1]) @ W  ==  x @ W[:dim] + t_net_1 @ W[dim:]
    h = _act(dot(x.astype(bf16), st_w1x[...])
             + dot(t_net_1.astype(bf16), st_w1t[...]) + st_b1[...])
    h = _act(dot(h.astype(bf16), st_w2[...]) + st_b2[...])
    out_state = dot(h.astype(bf16), st_w3[...]) + st_b3[...]         # (TB, DPAD)
    out_state = jnp.clip(out_state, -NN_CLIP, NN_CLIP)

    out_ref[...] = out_state + t_net_2 * grad_val


def init_params(key, dim, cons_alpha=0.0):
    """Parameters in canonical (in, out) layout, mirroring the module __init__.

    nn.Linear: uniform(+-1/sqrt(fan_in)) (PyTorch default).
    LinearConsInit(C, dim, alpha): weight = eye(dim, C)*alpha (stored transposed),
    bias = 0.  LinearZero(C, dim): zero weight/bias.
    """
    C = CHANNELS

    def linear(k, fan_in, fan_out):
        k1, k2 = jax.random.split(k)
        bound = 1.0 / math.sqrt(fan_in)
        w = jax.random.uniform(k1, (fan_in, fan_out), jnp.float32, -bound, bound)
        b = jax.random.uniform(k2, (1, fan_out), jnp.float32, -bound, bound)
        return w, b

    keys = jax.random.split(key, 7)
    p = {}
    p["coeff"] = jnp.linspace(0.1, 100.0, C).reshape(1, C).astype(jnp.float32)
    p["phase"] = jnp.zeros((1, C), jnp.float32)

    p["ts_w1"], p["ts_b1"] = linear(keys[0], EMB, C)
    p["ts_w2"], p["ts_b2"] = linear(keys[1], C, C)

    p["tg_w0"], p["tg_b0"] = linear(keys[2], EMB, C)
    p["tg_w1"], p["tg_b1"] = linear(keys[3], C, C)
    p["tg_w2"], p["tg_b2"] = linear(keys[4], C, C)
    # LinearConsInit(C, dim, alpha): torch weight eye(dim, C)*alpha -> transposed
    p["tg_w3"] = (jnp.eye(C, dim) * cons_alpha).astype(jnp.float32)
    p["tg_b3"] = jnp.zeros((1, dim), jnp.float32)

    p["st_w1"], p["st_b1"] = linear(keys[5], dim + C, C)
    p["st_w2"], p["st_b2"] = linear(keys[6], C, C)
    # LinearZero(C, dim)
    p["st_w3"] = jnp.zeros((C, dim), jnp.float32)
    p["st_b3"] = jnp.zeros((1, dim), jnp.float32)
    return p


def pisgradnet_forward(params, input_array, time_array, target_fn, *, tile_b=512):
    """nan_to_num + grad of the user target computed in JAX; MLP stack in Pallas."""
    C = CHANNELS
    x = jnp.nan_to_num(input_array).astype(jnp.float32)
    # torch.autograd.grad(target(x).sum(), x) equivalent
    grad_val = jax.grad(lambda z: jnp.sum(target_fn(z)))(x).astype(jnp.float32)
    t = time_array.astype(jnp.float32)

    B, dim = x.shape
    dpad = _round_up(max(dim, LANE), LANE)          # lane-dense feature axis
    tile_b = min(tile_b, _round_up(B, 8))           # multiple of 8 sublanes
    b_pad = _round_up(B, tile_b)

    def pad2(a, rows, cols):
        return jnp.pad(a, ((0, rows - a.shape[0]), (0, cols - a.shape[1])))

    t_p = pad2(t, b_pad, 1)
    x_p = pad2(x, b_pad, dpad)
    g_p = pad2(grad_val, b_pad, dpad)

    bf16, f32 = jnp.bfloat16, jnp.float32
    weights = (
        params["coeff"].astype(f32), params["phase"].astype(f32),
        # time_coder_state (first layer K-split over [sin | cos])
        params["ts_w1"][:C].astype(bf16), params["ts_w1"][C:].astype(bf16),
        params["ts_b1"].astype(f32),
        params["ts_w2"].astype(bf16), params["ts_b2"].astype(f32),
        # time_coder_grad
        params["tg_w0"][:C].astype(bf16), params["tg_w0"][C:].astype(bf16),
        params["tg_b0"].astype(f32),
        params["tg_w1"].astype(bf16), params["tg_b1"].astype(f32),
        params["tg_w2"].astype(bf16), params["tg_b2"].astype(f32),
        pad2(params["tg_w3"], C, dpad).astype(bf16),
        pad2(params["tg_b3"], 1, dpad).astype(f32),
        # state_time_net (first layer K-split over [x | t_net_1])
        pad2(params["st_w1"][:dim], dpad, C).astype(bf16),
        params["st_w1"][dim:].astype(bf16), params["st_b1"].astype(f32),
        params["st_w2"].astype(bf16), params["st_b2"].astype(f32),
        pad2(params["st_w3"], C, dpad).astype(bf16),
        pad2(params["st_b3"], 1, dpad).astype(f32),
    )

    # Batch-varying operands follow the grid; weights pin to block (0, 0).
    in_specs = [pl.BlockSpec((tile_b, 1), lambda i: (i, 0)),
                pl.BlockSpec((tile_b, dpad), lambda i: (i, 0)),
                pl.BlockSpec((tile_b, dpad), lambda i: (i, 0))]
    in_specs += [pl.BlockSpec(w.shape, lambda i: (0, 0)) for w in weights]
    out_spec = pl.BlockSpec((tile_b, dpad), lambda i: (i, 0))

    macs_per_row = (EMB * C + C * C                       # time_coder_state
                    + EMB * C + 2 * C * C + C * dpad      # time_coder_grad
                    + (dpad + C) * C + C * C + C * dpad)  # state_time_net
    weight_bytes = sum(int(w.size) * w.dtype.itemsize for w in weights)
    cost = pl.CostEstimate(
        flops=int(2 * macs_per_row * b_pad),
        transcendentals=int(8 * C * b_pad),               # sin+cos + 6 GELU per row
        bytes_accessed=int(4 * b_pad * (1 + 3 * dpad)) + weight_bytes,
    )

    out_padded = pl.pallas_call(
        pisgrad_kernel,
        out_shape=jax.ShapeDtypeStruct((b_pad, dpad), jnp.float32),
        grid=(b_pad // tile_b,),
        in_specs=in_specs,
        out_specs=out_spec,
        compiler_params=pltpu.CompilerParams(
            dimension_semantics=("parallel",),
            vmem_limit_bytes=32 * 1024 * 1024),
        cost_estimate=cost,
    )(t_p, x_p, g_p, *weights)

    return out_padded[:B, :dim]


def reference_forward(params, input_array, time_array, target_fn):
    """Pure-JAX f32 reference of the module forward (for the smoke test)."""
    x = jnp.nan_to_num(input_array).astype(jnp.float32)
    g = jnp.clip(jax.grad(lambda z: jnp.sum(target_fn(z)))(x), -LGV_CLIP, LGV_CLIP)
    t = time_array.astype(jnp.float32)
    arg = params["coeff"] * t + params["phase"]
    emb = jnp.concatenate([jnp.sin(arg), jnp.cos(arg)], axis=-1)
    h = _act(emb @ params["ts_w1"] + params["ts_b1"])
    t_net_1 = h @ params["ts_w2"] + params["ts_b2"]
    h = _act(emb @ params["tg_w0"] + params["tg_b0"])
    h = _act(h @ params["tg_w1"] + params["tg_b1"])
    h = _act(h @ params["tg_w2"] + params["tg_b2"])
    t_net_2 = h @ params["tg_w3"] + params["tg_b3"]
    ext = jnp.concatenate([x, t_net_1], axis=-1)
    h = _act(ext @ params["st_w1"] + params["st_b1"])
    h = _act(h @ params["st_w2"] + params["st_b2"])
    out_state = jnp.clip(h @ params["st_w3"] + params["st_b3"], -NN_CLIP, NN_CLIP)
    return out_state + t_net_2 * g


if __name__ == "__main__":
    key = jax.random.PRNGKey(0)
    kp, kx, kt, kw = jax.random.split(key, 4)

    B, dim = 80, 8
    # Nonzero LinearConsInit alpha + a nonzero state head so the smoke test
    # exercises every layer (at true init both heads are zero -> output is 0).
    params = init_params(kp, dim, cons_alpha=0.5)
    params["st_w3"] = 0.05 * jax.random.normal(kw, (CHANNELS, dim), jnp.float32)

    input_array = jax.random.normal(kx, (B, dim), jnp.float32)
    time_array = jax.random.uniform(kt, (B, 1), jnp.float32)

    # synthetic target: log-density of N(0, I) (up to a constant); grad = -x
    target_fn = lambda z: -0.5 * jnp.sum(z * z, axis=-1)

    # small tile_b so the smoke test exercises a multi-step batch grid (3 tiles)
    out = pisgradnet_forward(params, input_array, time_array, target_fn, tile_b=32)
    out = jax.block_until_ready(out)

    ref = reference_forward(params, input_array, time_array, target_fn)
    assert out.shape == (B, dim) and out.dtype == jnp.float32
    assert bool(jnp.all(jnp.isfinite(out)))
    max_err = float(jnp.max(jnp.abs(out - ref)))
    scale = float(jnp.max(jnp.abs(ref))) + 1.0
    assert max_err < 0.05 * scale, f"max abs err {max_err} vs scale {scale}"
    print("KERNEL_OK")
</pallas_src>

<mosaic_0001>
module attributes {stable_mosaic.version = 11 : i64} {
  func.func @pisgrad_kernel(%arg0: i32, %arg1: memref<32x1xf32, #tpu.memory_space<vmem>>, %arg2: memref<32x128xf32, #tpu.memory_space<vmem>>, %arg3: memref<32x128xf32, #tpu.memory_space<vmem>>, %arg4: memref<1x64xf32, #tpu.memory_space<vmem>>, %arg5: memref<1x64xf32, #tpu.memory_space<vmem>>, %arg6: memref<64x64xbf16, #tpu.memory_space<vmem>>, %arg7: memref<64x64xbf16, #tpu.memory_space<vmem>>, %arg8: memref<1x64xf32, #tpu.memory_space<vmem>>, %arg9: memref<64x64xbf16, #tpu.memory_space<vmem>>, %arg10: memref<1x64xf32, #tpu.memory_space<vmem>>, %arg11: memref<64x64xbf16, #tpu.memory_space<vmem>>, %arg12: memref<64x64xbf16, #tpu.memory_space<vmem>>, %arg13: memref<1x64xf32, #tpu.memory_space<vmem>>, %arg14: memref<64x64xbf16, #tpu.memory_space<vmem>>, %arg15: memref<1x64xf32, #tpu.memory_space<vmem>>, %arg16: memref<64x64xbf16, #tpu.memory_space<vmem>>, %arg17: memref<1x64xf32, #tpu.memory_space<vmem>>, %arg18: memref<64x128xbf16, #tpu.memory_space<vmem>>, %arg19: memref<1x128xf32, #tpu.memory_space<vmem>>, %arg20: memref<128x64xbf16, #tpu.memory_space<vmem>>, %arg21: memref<64x64xbf16, #tpu.memory_space<vmem>>, %arg22: memref<1x64xf32, #tpu.memory_space<vmem>>, %arg23: memref<64x64xbf16, #tpu.memory_space<vmem>>, %arg24: memref<1x64xf32, #tpu.memory_space<vmem>>, %arg25: memref<64x128xbf16, #tpu.memory_space<vmem>>, %arg26: memref<1x128xf32, #tpu.memory_space<vmem>>, %arg27: memref<32x128xf32, #tpu.memory_space<vmem>>) attributes {dimension_semantics = [#tpu.dimension_semantics<parallel>], iteration_bounds = array<i64: 3>, scalar_prefetch = 0 : i64, scratch_operands = 0 : i64, tpu.core_type = #tpu.core_type<tc>, window_params = [{transform_indices = @transform_0, window_bounds = array<i64: 32, 1>}, {transform_indices = @transform_1, window_bounds = array<i64: 32, 128>}, {transform_indices = @transform_2, window_bounds = array<i64: 32, 128>}, {pipeline_mode = #tpu.pipeline_mode<synchronous>, transform_indices = @transform_3, window_bounds = array<i64: 1, 64>}, {pipeline_mode = #tpu.pipeline_mode<synchronous>, transform_indices = @transform_4, window_bounds = array<i64: 1, 64>}, {pipeline_mode = #tpu.pipeline_mode<synchronous>, transform_indices = @transform_5, window_bounds = array<i64: 64, 64>}, {pipeline_mode = #tpu.pipeline_mode<synchronous>, transform_indices = @transform_6, window_bounds = array<i64: 64, 64>}, {pipeline_mode = #tpu.pipeline_mode<synchronous>, transform_indices = @transform_7, window_bounds = array<i64: 1, 64>}, {pipeline_mode = #tpu.pipeline_mode<synchronous>, transform_indices = @transform_8, window_bounds = array<i64: 64, 64>}, {pipeline_mode = #tpu.pipeline_mode<synchronous>, transform_indices = @transform_9, window_bounds = array<i64: 1, 64>}, {pipeline_mode = #tpu.pipeline_mode<synchronous>, transform_indices = @transform_10, window_bounds = array<i64: 64, 64>}, {pipeline_mode = #tpu.pipeline_mode<synchronous>, transform_indices = @transform_11, window_bounds = array<i64: 64, 64>}, {pipeline_mode = #tpu.pipeline_mode<synchronous>, transform_indices = @transform_12, window_bounds = array<i64: 1, 64>}, {pipeline_mode = #tpu.pipeline_mode<synchronous>, transform_indices = @transform_13, window_bounds = array<i64: 64, 64>}, {pipeline_mode = #tpu.pipeline_mode<synchronous>, transform_indices = @transform_14, window_bounds = array<i64: 1, 64>}, {pipeline_mode = #tpu.pipeline_mode<synchronous>, transform_indices = @transform_15, window_bounds = array<i64: 64, 64>}, {pipeline_mode = #tpu.pipeline_mode<synchronous>, transform_indices = @transform_16, window_bounds = array<i64: 1, 64>}, {pipeline_mode = #tpu.pipeline_mode<synchronous>, transform_indices = @transform_17, window_bounds = array<i64: 64, 128>}, {pipeline_mode = #tpu.pipeline_mode<synchronous>, transform_indices = @transform_18, window_bounds = array<i64: 1, 128>}, {pipeline_mode = #tpu.pipeline_mode<synchronous>, transform_indices = @transform_19, window_bounds = array<i64: 128, 64>}, {pipeline_mode = #tpu.pipeline_mode<synchronous>, transform_indices = @transform_20, window_bounds = array<i64: 64, 64>}, {pipeline_mode = #tpu.pipeline_mode<synchronous>, transform_indices = @transform_21, window_bounds = array<i64: 1, 64>}, {pipeline_mode = #tpu.pipeline_mode<synchronous>, transform_indices = @transform_22, window_bounds = array<i64: 64, 64>}, {pipeline_mode = #tpu.pipeline_mode<synchronous>, transform_indices = @transform_23, window_bounds = array<i64: 1, 64>}, {pipeline_mode = #tpu.pipeline_mode<synchronous>, transform_indices = @transform_24, window_bounds = array<i64: 64, 128>}, {pipeline_mode = #tpu.pipeline_mode<synchronous>, transform_indices = @transform_25, window_bounds = array<i64: 1, 128>}, {transform_indices = @transform_26, window_bounds = array<i64: 32, 128>}]} {
    %c0 = arith.constant 0 : index
    %c0_0 = arith.constant 0 : index
    %0 = vector.load %arg1[%c0, %c0_0] : memref<32x1xf32, #tpu.memory_space<vmem>>, vector<32x1xf32>
    %c0_1 = arith.constant 0 : index
    %c0_2 = arith.constant 0 : index
    %1 = vector.load %arg4[%c0_1, %c0_2] : memref<1x64xf32, #tpu.memory_space<vmem>>, vector<1x64xf32>
    %2 = vector.broadcast %1 : vector<1x64xf32> to vector<32x64xf32>
    %3 = vector.broadcast %0 : vector<32x1xf32> to vector<32x64xf32>
    %4 = arith.mulf %2, %3 : vector<32x64xf32>
    %c0_3 = arith.constant 0 : index
    %c0_4 = arith.constant 0 : index
    %5 = vector.load %arg5[%c0_3, %c0_4] : memref<1x64xf32, #tpu.memory_space<vmem>>, vector<1x64xf32>
    %6 = vector.broadcast %5 : vector<1x64xf32> to vector<32x64xf32>
    %7 = arith.addf %4, %6 : vector<32x64xf32>
    %8 = math.sin %7 : vector<32x64xf32>
    %9 = arith.truncf %8 : vector<32x64xf32> to vector<32x64xbf16>
    %10 = math.cos %7 : vector<32x64xf32>
    %11 = arith.truncf %10 : vector<32x64xf32> to vector<32x64xbf16>
    %c0_5 = arith.constant 0 : index
    %c0_6 = arith.constant 0 : index
    %12 = vector.load %arg2[%c0_5, %c0_6] : memref<32x128xf32, #tpu.memory_space<vmem>>, vector<32x128xf32>
    %c0_7 = arith.constant 0 : index
    %c0_8 = arith.constant 0 : index
    %13 = vector.load %arg3[%c0_7, %c0_8] : memref<32x128xf32, #tpu.memory_space<vmem>>, vector<32x128xf32>
    %cst = arith.constant -1.000000e+02 : f32
    %cst_9 = arith.constant 1.000000e+02 : f32
    %14 = vector.broadcast %cst : f32 to vector<32x128xf32>
    %15 = arith.maximumf %14, %13 : vector<32x128xf32>
    %16 = vector.broadcast %cst_9 : f32 to vector<32x128xf32>
    %17 = arith.minimumf %16, %15 : vector<32x128xf32>
    %c0_10 = arith.constant 0 : index
    %c0_11 = arith.constant 0 : index
    %18 = vector.load %arg6[%c0_10, %c0_11] : memref<64x64xbf16, #tpu.memory_space<vmem>>, vector<64x64xbf16>
    %cst_12 = arith.constant dense<0.000000e+00> : vector<32x64xf32>
    %19 = tpu.matmul %9, %18, %cst_12 {dimension_numbers = #tpu.dot_dimension_numbers<[1], [0], [0], [1], [0, 0, 1, 1], [], []>} : vector<32x64xbf16>, vector<64x64xbf16>, vector<32x64xf32> -> vector<32x64xf32>
    %c0_13 = arith.constant 0 : index
    %c0_14 = arith.constant 0 : index
    %20 = vector.load %arg7[%c0_13, %c0_14] : memref<64x64xbf16, #tpu.memory_space<vmem>>, vector<64x64xbf16>
    %cst_15 = arith.constant dense<0.000000e+00> : vector<32x64xf32>
    %21 = tpu.matmul %11, %20, %cst_15 {dimension_numbers = #tpu.dot_dimension_numbers<[1], [0], [0], [1], [0, 0, 1, 1], [], []>} : vector<32x64xbf16>, vector<64x64xbf16>, vector<32x64xf32> -> vector<32x64xf32>
    %22 = arith.addf %19, %21 : vector<32x64xf32>
    %c0_16 = arith.constant 0 : index
    %c0_17 = arith.constant 0 : index
    %23 = vector.load %arg8[%c0_16, %c0_17] : memref<1x64xf32, #tpu.memory_space<vmem>>, vector<1x64xf32>
    %24 = vector.broadcast %23 : vector<1x64xf32> to vector<32x64xf32>
    %25 = arith.addf %22, %24 : vector<32x64xf32>
    %26 = arith.mulf %25, %25 : vector<32x64xf32>
    %27 = arith.mulf %25, %26 : vector<32x64xf32>
    %cst_18 = arith.constant 4.471500e-02 : f32
    %28 = vector.broadcast %cst_18 : f32 to vector<32x64xf32>
    %29 = arith.mulf %28, %27 : vector<32x64xf32>
    %30 = arith.addf %25, %29 : vector<32x64xf32>
    %cst_19 = arith.constant 0.797884583 : f32
    %31 = vector.broadcast %cst_19 : f32 to vector<32x64xf32>
    %32 = arith.mulf %31, %30 : vector<32x64xf32>
    %33 = math.tanh %32 : vector<32x64xf32>
    %cst_20 = arith.constant 1.000000e+00 : f32
    %34 = vector.broadcast %cst_20 : f32 to vector<32x64xf32>
    %35 = arith.addf %34, %33 : vector<32x64xf32>
    %cst_21 = arith.constant 5.000000e-01 : f32
    %36 = vector.broadcast %cst_21 : f32 to vector<32x64xf32>
    %37 = arith.mulf %36, %35 : vector<32x64xf32>
    %38 = arith.mulf %25, %37 : vector<32x64xf32>
    %39 = arith.truncf %38 : vector<32x64xf32> to vector<32x64xbf16>
    %c0_22 = arith.constant 0 : index
    %c0_23 = arith.constant 0 : index
    %40 = vector.load %arg9[%c0_22, %c0_23] : memref<64x64xbf16, #tpu.memory_space<vmem>>, vector<64x64xbf16>
    %cst_24 = arith.constant dense<0.000000e+00> : vector<32x64xf32>
    %41 = tpu.matmul %39, %40, %cst_24 {dimension_numbers = #tpu.dot_dimension_numbers<[1], [0], [0], [1], [0, 0, 1, 1], [], []>} : vector<32x64xbf16>, vector<64x64xbf16>, vector<32x64xf32> -> vector<32x64xf32>
    %c0_25 = arith.constant 0 : index
    %c0_26 = arith.constant 0 : index
    %42 = vector.load %arg10[%c0_25, %c0_26] : memref<1x64xf32, #tpu.memory_space<vmem>>, vector<1x64xf32>
    %43 = vector.broadcast %42 : vector<1x64xf32> to vector<32x64xf32>
    %44 = arith.addf %41, %43 : vector<32x64xf32>
    %c0_27 = arith.constant 0 : index
    %c0_28 = arith.constant 0 : index
    %45 = vector.load %arg11[%c0_27, %c0_28] : memref<64x64xbf16, #tpu.memory_space<vmem>>, vector<64x64xbf16>
    %cst_29 = arith.constant dense<0.000000e+00> : vector<32x64xf32>
    %46 = tpu.matmul %9, %45, %cst_29 {dimension_numbers = #tpu.dot_dimension_numbers<[1], [0], [0], [1], [0, 0, 1, 1], [], []>} : vector<32x64xbf16>, vector<64x64xbf16>, vector<32x64xf32> -> vector<32x64xf32>
    %c0_30 = arith.constant 0 : index
    %c0_31 = arith.constant 0 : index
    %47 = vector.load %arg12[%c0_30, %c0_31] : memref<64x64xbf16, #tpu.memory_space<vmem>>, vector<64x64xbf16>
    %cst_32 = arith.constant dense<0.000000e+00> : vector<32x64xf32>
    %48 = tpu.matmul %11, %47, %cst_32 {dimension_numbers = #tpu.dot_dimension_numbers<[1], [0], [0], [1], [0, 0, 1, 1], [], []>} : vector<32x64xbf16>, vector<64x64xbf16>, vector<32x64xf32> -> vector<32x64xf32>
    %49 = arith.addf %46, %48 : vector<32x64xf32>
    %c0_33 = arith.constant 0 : index
    %c0_34 = arith.constant 0 : index
    %50 = vector.load %arg13[%c0_33, %c0_34] : memref<1x64xf32, #tpu.memory_space<vmem>>, vector<1x64xf32>
    %51 = vector.broadcast %50 : vector<1x64xf32> to vector<32x64xf32>
    %52 = arith.addf %49, %51 : vector<32x64xf32>
    %53 = arith.mulf %52, %52 : vector<32x64xf32>
    %54 = arith.mulf %52, %53 : vector<32x64xf32>
    %cst_35 = arith.constant 4.471500e-02 : f32
    %55 = vector.broadcast %cst_35 : f32 to vector<32x64xf32>
    %56 = arith.mulf %55, %54 : vector<32x64xf32>
    %57 = arith.addf %52, %56 : vector<32x64xf32>
    %cst_36 = arith.constant 0.797884583 : f32
    %58 = vector.broadcast %cst_36 : f32 to vector<32x64xf32>
    %59 = arith.mulf %58, %57 : vector<32x64xf32>
    %60 = math.tanh %59 : vector<32x64xf32>
    %cst_37 = arith.constant 1.000000e+00 : f32
    %61 = vector.broadcast %cst_37 : f32 to vector<32x64xf32>
    %62 = arith.addf %61, %60 : vector<32x64xf32>
    %cst_38 = arith.constant 5.000000e-01 : f32
    %63 = vector.broadcast %cst_38 : f32 to vector<32x64xf32>
    %64 = arith.mulf %63, %62 : vector<32x64xf32>
    %65 = arith.mulf %52, %64 : vector<32x64xf32>
    %66 = arith.truncf %65 : vector<32x64xf32> to vector<32x64xbf16>
    %c0_39 = arith.constant 0 : index
    %c0_40 = arith.constant 0 : index
    %67 = vector.load %arg14[%c0_39, %c0_40] : memref<64x64xbf16, #tpu.memory_space<vmem>>, vector<64x64xbf16>
    %cst_41 = arith.constant dense<0.000000e+00> : vector<32x64xf32>
    %68 = tpu.matmul %66, %67, %cst_41 {dimension_numbers = #tpu.dot_dimension_numbers<[1], [0], [0], [1], [0, 0, 1, 1], [], []>} : vector<32x64xbf16>, vector<64x64xbf16>, vector<32x64xf32> -> vector<32x64xf32>
    %c0_42 = arith.constant 0 : index
    %c0_43 = arith.constant 0 : index
    %69 = vector.load %arg15[%c0_42, %c0_43] : memref<1x64xf32, #tpu.memory_space<vmem>>, vector<1x64xf32>
    %70 = vector.broadcast %69 : vector<1x64xf32> to vector<32x64xf32>
    %71 = arith.addf %68, %70 : vector<32x64xf32>
    %72 = arith.mulf %71, %71 : vector<32x64xf32>
    %73 = arith.mulf %71, %72 : vector<32x64xf32>
    %cst_44 = arith.constant 4.471500e-02 : f32
    %74 = vector.broadcast %cst_44 : f32 to vector<32x64xf32>
    %75 = arith.mulf %74, %73 : vector<32x64xf32>
    %76 = arith.addf %71, %75 : vector<32x64xf32>
    %cst_45 = arith.constant 0.797884583 : f32
    %77 = vector.broadcast %cst_45 : f32 to vector<32x64xf32>
    %78 = arith.mulf %77, %76 : vector<32x64xf32>
    %79 = math.tanh %78 : vector<32x64xf32>
    %cst_46 = arith.constant 1.000000e+00 : f32
    %80 = vector.broadcast %cst_46 : f32 to vector<32x64xf32>
    %81 = arith.addf %80, %79 : vector<32x64xf32>
    %cst_47 = arith.constant 5.000000e-01 : f32
    %82 = vector.broadcast %cst_47 : f32 to vector<32x64xf32>
    %83 = arith.mulf %82, %81 : vector<32x64xf32>
    %84 = arith.mulf %71, %83 : vector<32x64xf32>
    %85 = arith.truncf %84 : vector<32x64xf32> to vector<32x64xbf16>
    %c0_48 = arith.constant 0 : index
    %c0_49 = arith.constant 0 : index
    %86 = vector.load %arg16[%c0_48, %c0_49] : memref<64x64xbf16, #tpu.memory_space<vmem>>, vector<64x64xbf16>
    %cst_50 = arith.constant dense<0.000000e+00> : vector<32x64xf32>
    %87 = tpu.matmul %85, %86, %cst_50 {dimension_numbers = #tpu.dot_dimension_numbers<[1], [0], [0], [1], [0, 0, 1, 1], [], []>} : vector<32x64xbf16>, vector<64x64xbf16>, vector<32x64xf32> -> vector<32x64xf32>
    %c0_51 = arith.constant 0 : index
    %c0_52 = arith.constant 0 : index
    %88 = vector.load %arg17[%c0_51, %c0_52] : memref<1x64xf32, #tpu.memory_space<vmem>>, vector<1x64xf32>
    %89 = vector.broadcast %88 : vector<1x64xf32> to vector<32x64xf32>
    %90 = arith.addf %87, %89 : vector<32x64xf32>
    %91 = arith.mulf %90, %90 : vector<32x64xf32>
    %92 = arith.mulf %90, %91 : vector<32x64xf32>
    %cst_53 = arith.constant 4.471500e-02 : f32
    %93 = vector.broadcast %cst_53 : f32 to vector<32x64xf32>
    %94 = arith.mulf %93, %92 : vector<32x64xf32>
    %95 = arith.addf %90, %94 : vector<32x64xf32>
    %cst_54 = arith.constant 0.797884583 : f32
    %96 = vector.broadcast %cst_54 : f32 to vector<32x64xf32>
    %97 = arith.mulf %96, %95 : vector<32x64xf32>
    %98 = math.tanh %97 : vector<32x64xf32>
    %cst_55 = arith.constant 1.000000e+00 : f32
    %99 = vector.broadcast %cst_55 : f32 to vector<32x64xf32>
    %100 = arith.addf %99, %98 : vector<32x64xf32>
    %cst_56 = arith.constant 5.000000e-01 : f32
    %101 = vector.broadcast %cst_56 : f32 to vector<32x64xf32>
    %102 = arith.mulf %101, %100 : vector<32x64xf32>
    %103 = arith.mulf %90, %102 : vector<32x64xf32>
    %104 = arith.truncf %103 : vector<32x64xf32> to vector<32x64xbf16>
    %c0_57 = arith.constant 0 : index
    %c0_58 = arith.constant 0 : index
    %105 = vector.load %arg18[%c0_57, %c0_58] : memref<64x128xbf16, #tpu.memory_space<vmem>>, vector<64x128xbf16>
    %cst_59 = arith.constant dense<0.000000e+00> : vector<32x128xf32>
    %106 = tpu.matmul %104, %105, %cst_59 {dimension_numbers = #tpu.dot_dimension_numbers<[1], [0], [0], [1], [0, 0, 1, 1], [], []>} : vector<32x64xbf16>, vector<64x128xbf16>, vector<32x128xf32> -> vector<32x128xf32>
    %c0_60 = arith.constant 0 : index
    %c0_61 = arith.constant 0 : index
    %107 = vector.load %arg19[%c0_60, %c0_61] : memref<1x128xf32, #tpu.memory_space<vmem>>, vector<1x128xf32>
    %108 = vector.broadcast %107 : vector<1x128xf32> to vector<32x128xf32>
    %109 = arith.addf %106, %108 : vector<32x128xf32>
    %110 = arith.truncf %12 : vector<32x128xf32> to vector<32x128xbf16>
    %c0_62 = arith.constant 0 : index
    %c0_63 = arith.constant 0 : index
    %111 = vector.load %arg20[%c0_62, %c0_63] : memref<128x64xbf16, #tpu.memory_space<vmem>>, vector<128x64xbf16>
    %cst_64 = arith.constant dense<0.000000e+00> : vector<32x64xf32>
    %112 = tpu.matmul %110, %111, %cst_64 {dimension_numbers = #tpu.dot_dimension_numbers<[1], [0], [0], [1], [0, 0, 1, 1], [], []>} : vector<32x128xbf16>, vector<128x64xbf16>, vector<32x64xf32> -> vector<32x64xf32>
    %113 = arith.truncf %44 : vector<32x64xf32> to vector<32x64xbf16>
    %c0_65 = arith.constant 0 : index
    %c0_66 = arith.constant 0 : index
    %114 = vector.load %arg21[%c0_65, %c0_66] : memref<64x64xbf16, #tpu.memory_space<vmem>>, vector<64x64xbf16>
    %cst_67 = arith.constant dense<0.000000e+00> : vector<32x64xf32>
    %115 = tpu.matmul %113, %114, %cst_67 {dimension_numbers = #tpu.dot_dimension_numbers<[1], [0], [0], [1], [0, 0, 1, 1], [], []>} : vector<32x64xbf16>, vector<64x64xbf16>, vector<32x64xf32> -> vector<32x64xf32>
    %116 = arith.addf %112, %115 : vector<32x64xf32>
    %c0_68 = arith.constant 0 : index
    %c0_69 = arith.constant 0 : index
    %117 = vector.load %arg22[%c0_68, %c0_69] : memref<1x64xf32, #tpu.memory_space<vmem>>, vector<1x64xf32>
    %118 = vector.broadcast %117 : vector<1x64xf32> to vector<32x64xf32>
    %119 = arith.addf %116, %118 : vector<32x64xf32>
    %120 = arith.mulf %119, %119 : vector<32x64xf32>
    %121 = arith.mulf %119, %120 : vector<32x64xf32>
    %cst_70 = arith.constant 4.471500e-02 : f32
    %122 = vector.broadcast %cst_70 : f32 to vector<32x64xf32>
    %123 = arith.mulf %122, %121 : vector<32x64xf32>
    %124 = arith.addf %119, %123 : vector<32x64xf32>
    %cst_71 = arith.constant 0.797884583 : f32
    %125 = vector.broadcast %cst_71 : f32 to vector<32x64xf32>
    %126 = arith.mulf %125, %124 : vector<32x64xf32>
    %127 = math.tanh %126 : vector<32x64xf32>
    %cst_72 = arith.constant 1.000000e+00 : f32
    %128 = vector.broadcast %cst_72 : f32 to vector<32x64xf32>
    %129 = arith.addf %128, %127 : vector<32x64xf32>
    %cst_73 = arith.constant 5.000000e-01 : f32
    %130 = vector.broadcast %cst_73 : f32 to vector<32x64xf32>
    %131 = arith.mulf %130, %129 : vector<32x64xf32>
    %132 = arith.mulf %119, %131 : vector<32x64xf32>
    %133 = arith.truncf %132 : vector<32x64xf32> to vector<32x64xbf16>
    %c0_74 = arith.constant 0 : index
    %c0_75 = arith.constant 0 : index
    %134 = vector.load %arg23[%c0_74, %c0_75] : memref<64x64xbf16, #tpu.memory_space<vmem>>, vector<64x64xbf16>
    %cst_76 = arith.constant dense<0.000000e+00> : vector<32x64xf32>
    %135 = tpu.matmul %133, %134, %cst_76 {dimension_numbers = #tpu.dot_dimension_numbers<[1], [0], [0], [1], [0, 0, 1, 1], [], []>} : vector<32x64xbf16>, vector<64x64xbf16>, vector<32x64xf32> -> vector<32x64xf32>
    %c0_77 = arith.constant 0 : index
    %c0_78 = arith.constant 0 : index
    %136 = vector.load %arg24[%c0_77, %c0_78] : memref<1x64xf32, #tpu.memory_space<vmem>>, vector<1x64xf32>
    %137 = vector.broadcast %136 : vector<1x64xf32> to vector<32x64xf32>
    %138 = arith.addf %135, %137 : vector<32x64xf32>
    %139 = arith.mulf %138, %138 : vector<32x64xf32>
    %140 = arith.mulf %138, %139 : vector<32x64xf32>
    %cst_79 = arith.constant 4.471500e-02 : f32
    %141 = vector.broadcast %cst_79 : f32 to vector<32x64xf32>
    %142 = arith.mulf %141, %140 : vector<32x64xf32>
    %143 = arith.addf %138, %142 : vector<32x64xf32>
    %cst_80 = arith.constant 0.797884583 : f32
    %144 = vector.broadcast %cst_80 : f32 to vector<32x64xf32>
    %145 = arith.mulf %144, %143 : vector<32x64xf32>
    %146 = math.tanh %145 : vector<32x64xf32>
    %cst_81 = arith.constant 1.000000e+00 : f32
    %147 = vector.broadcast %cst_81 : f32 to vector<32x64xf32>
    %148 = arith.addf %147, %146 : vector<32x64xf32>
    %cst_82 = arith.constant 5.000000e-01 : f32
    %149 = vector.broadcast %cst_82 : f32 to vector<32x64xf32>
    %150 = arith.mulf %149, %148 : vector<32x64xf32>
    %151 = arith.mulf %138, %150 : vector<32x64xf32>
    %152 = arith.truncf %151 : vector<32x64xf32> to vector<32x64xbf16>
    %c0_83 = arith.constant 0 : index
    %c0_84 = arith.constant 0 : index
    %153 = vector.load %arg25[%c0_83, %c0_84] : memref<64x128xbf16, #tpu.memory_space<vmem>>, vector<64x128xbf16>
    %cst_85 = arith.constant dense<0.000000e+00> : vector<32x128xf32>
    %154 = tpu.matmul %152, %153, %cst_85 {dimension_numbers = #tpu.dot_dimension_numbers<[1], [0], [0], [1], [0, 0, 1, 1], [], []>} : vector<32x64xbf16>, vector<64x128xbf16>, vector<32x128xf32> -> vector<32x128xf32>
    %c0_86 = arith.constant 0 : index
    %c0_87 = arith.constant 0 : index
    %155 = vector.load %arg26[%c0_86, %c0_87] : memref<1x128xf32, #tpu.memory_space<vmem>>, vector<1x128xf32>
    %156 = vector.broadcast %155 : vector<1x128xf32> to vector<32x128xf32>
    %157 = arith.addf %154, %156 : vector<32x128xf32>
    %cst_88 = arith.constant -1.000000e+04 : f32
    %cst_89 = arith.constant 1.000000e+04 : f32
    %158 = vector.broadcast %cst_88 : f32 to vector<32x128xf32>
    %159 = arith.maximumf %158, %157 : vector<32x128xf32>
    %160 = vector.broadcast %cst_89 : f32 to vector<32x128xf32>
    %161 = arith.minimumf %160, %159 : vector<32x128xf32>
    %162 = arith.mulf %109, %17 : vector<32x128xf32>
    %163 = arith.addf %161, %162 : vector<32x128xf32>
    %c0_90 = arith.constant 0 : index
    %c0_91 = arith.constant 0 : index
    %164 = vector.load %arg27[%c0_90, %c0_91] : memref<32x128xf32, #tpu.memory_space<vmem>>, vector<32x128xf32>
    tpu.vector_store %arg27[%c0_90, %c0_91], %163 {strides = array<i32>} : memref<32x128xf32, #tpu.memory_space<vmem>>, vector<32x128xf32>,
    return
  }
  func.func @transform_0(%arg0: i32) -> (i32, i32) {
    %c0_i32 = arith.constant 0 : i32
    %c0_i32_0 = arith.constant 0 : i32
    return %arg0, %c0_i32 : i32, i32
  }
  func.func @transform_1(%arg0: i32) -> (i32, i32) {
    %c0_i32 = arith.constant 0 : i32
    %c0_i32_0 = arith.constant 0 : i32
    return %arg0, %c0_i32 : i32, i32
  }
  func.func @transform_2(%arg0: i32) -> (i32, i32) {
    %c0_i32 = arith.constant 0 : i32
    %c0_i32_0 = arith.constant 0 : i32
    return %arg0, %c0_i32 : i32, i32
  }
  func.func @transform_3(%arg0: i32) -> (i32, i32) {
    %c0_i32 = arith.constant 0 : i32
    %c0_i32_0 = arith.constant 0 : i32
    %c0_i32_1 = arith.constant 0 : i32
    return %c0_i32, %c0_i32_0 : i32, i32
  }
  func.func @transform_4(%arg0: i32) -> (i32, i32) {
    %c0_i32 = arith.constant 0 : i32
    %c0_i32_0 = arith.constant 0 : i32
    %c0_i32_1 = arith.constant 0 : i32
    return %c0_i32, %c0_i32_0 : i32, i32
  }
  func.func @transform_5(%arg0: i32) -> (i32, i32) {
    %c0_i32 = arith.constant 0 : i32
    %c0_i32_0 = arith.constant 0 : i32
    %c0_i32_1 = arith.constant 0 : i32
    return %c0_i32, %c0_i32_0 : i32, i32
  }
  func.func @transform_6(%arg0: i32) -> (i32, i32) {
    %c0_i32 = arith.constant 0 : i32
    %c0_i32_0 = arith.constant 0 : i32
    %c0_i32_1 = arith.constant 0 : i32
    return %c0_i32, %c0_i32_0 : i32, i32
  }
  func.func @transform_7(%arg0: i32) -> (i32, i32) {
    %c0_i32 = arith.constant 0 : i32
    %c0_i32_0 = arith.constant 0 : i32
    %c0_i32_1 = arith.constant 0 : i32
    return %c0_i32, %c0_i32_0 : i32, i32
  }
  func.func @transform_8(%arg0: i32) -> (i32, i32) {
    %c0_i32 = arith.constant 0 : i32
    %c0_i32_0 = arith.constant 0 : i32
    %c0_i32_1 = arith.constant 0 : i32
    return %c0_i32, %c0_i32_0 : i32, i32
  }
  func.func @transform_9(%arg0: i32) -> (i32, i32) {
    %c0_i32 = arith.constant 0 : i32
    %c0_i32_0 = arith.constant 0 : i32
    %c0_i32_1 = arith.constant 0 : i32
    return %c0_i32, %c0_i32_0 : i32, i32
  }
  func.func @transform_10(%arg0: i32) -> (i32, i32) {
    %c0_i32 = arith.constant 0 : i32
    %c0_i32_0 = arith.constant 0 : i32
    %c0_i32_1 = arith.constant 0 : i32
    return %c0_i32, %c0_i32_0 : i32, i32
  }
  func.func @transform_11(%arg0: i32) -> (i32, i32) {
    %c0_i32 = arith.constant 0 : i32
    %c0_i32_0 = arith.constant 0 : i32
    %c0_i32_1 = arith.constant 0 : i32
    return %c0_i32, %c0_i32_0 : i32, i32
  }
  func.func @transform_12(%arg0: i32) -> (i32, i32) {
    %c0_i32 = arith.constant 0 : i32
    %c0_i32_0 = arith.constant 0 : i32
    %c0_i32_1 = arith.constant 0 : i32
    return %c0_i32, %c0_i32_0 : i32, i32
  }
  func.func @transform_13(%arg0: i32) -> (i32, i32) {
    %c0_i32 = arith.constant 0 : i32
    %c0_i32_0 = arith.constant 0 : i32
    %c0_i32_1 = arith.constant 0 : i32
    return %c0_i32, %c0_i32_0 : i32, i32
  }
  func.func @transform_14(%arg0: i32) -> (i32, i32) {
    %c0_i32 = arith.constant 0 : i32
    %c0_i32_0 = arith.constant 0 : i32
    %c0_i32_1 = arith.constant 0 : i32
    return %c0_i32, %c0_i32_0 : i32, i32
  }
  func.func @transform_15(%arg0: i32) -> (i32, i32) {
    %c0_i32 = arith.constant 0 : i32
    %c0_i32_0 = arith.constant 0 : i32
    %c0_i32_1 = arith.constant 0 : i32
    return %c0_i32, %c0_i32_0 : i32, i32
  }
  func.func @transform_16(%arg0: i32) -> (i32, i32) {
    %c0_i32 = arith.constant 0 : i32
    %c0_i32_0 = arith.constant 0 : i32
    %c0_i32_1 = arith.constant 0 : i32
    return %c0_i32, %c0_i32_0 : i32, i32
  }
  func.func @transform_17(%arg0: i32) -> (i32, i32) {
    %c0_i32 = arith.constant 0 : i32
    %c0_i32_0 = arith.constant 0 : i32
    %c0_i32_1 = arith.constant 0 : i32
    return %c0_i32, %c0_i32_0 : i32, i32
  }
  func.func @transform_18(%arg0: i32) -> (i32, i32) {
    %c0_i32 = arith.constant 0 : i32
    %c0_i32_0 = arith.constant 0 : i32
    %c0_i32_1 = arith.constant 0 : i32
    return %c0_i32, %c0_i32_0 : i32, i32
  }
  func.func @transform_19(%arg0: i32) -> (i32, i32) {
    %c0_i32 = arith.constant 0 : i32
    %c0_i32_0 = arith.constant 0 : i32
    %c0_i32_1 = arith.constant 0 : i32
    return %c0_i32, %c0_i32_0 : i32, i32
  }
  func.func @transform_20(%arg0: i32) -> (i32, i32) {
    %c0_i32 = arith.constant 0 : i32
    %c0_i32_0 = arith.constant 0 : i32
    %c0_i32_1 = arith.constant 0 : i32
    return %c0_i32, %c0_i32_0 : i32, i32
  }
  func.func @transform_21(%arg0: i32) -> (i32, i32) {
    %c0_i32 = arith.constant 0 : i32
    %c0_i32_0 = arith.constant 0 : i32
    %c0_i32_1 = arith.constant 0 : i32
    return %c0_i32, %c0_i32_0 : i32, i32
  }
  func.func @transform_22(%arg0: i32) -> (i32, i32) {
    %c0_i32 = arith.constant 0 : i32
    %c0_i32_0 = arith.constant 0 : i32
    %c0_i32_1 = arith.constant 0 : i32
    return %c0_i32, %c0_i32_0 : i32, i32
  }
  func.func @transform_23(%arg0: i32) -> (i32, i32) {
    %c0_i32 = arith.constant 0 : i32
    %c0_i32_0 = arith.constant 0 : i32
    %c0_i32_1 = arith.constant 0 : i32
    return %c0_i32, %c0_i32_0 : i32, i32
  }
  func.func @transform_24(%arg0: i32) -> (i32, i32) {
    %c0_i32 = arith.constant 0 : i32
    %c0_i32_0 = arith.constant 0 : i32
    %c0_i32_1 = arith.constant 0 : i32
    return %c0_i32, %c0_i32_0 : i32, i32
  }
  func.func @transform_25(%arg0: i32) -> (i32, i32) {
    %c0_i32 = arith.constant 0 : i32
    %c0_i32_0 = arith.constant 0 : i32
    %c0_i32_1 = arith.constant 0 : i32
    return %c0_i32, %c0_i32_0 : i32, i32
  }
  func.func @transform_26(%arg0: i32) -> (i32, i32) {
    %c0_i32 = arith.constant 0 : i32
    %c0_i32_0 = arith.constant 0 : i32
    return %arg0, %c0_i32 : i32, i32
  }
}

</mosaic_0001>

<bundles_post_ra>
// kernel: tpu_custom_call.1
= control target key start
LH: loop header
LB: loop body
LE: loop exit
PB: predicated region body
PF: predicated region fallthrough
CT: control target
= control target key end

     0   :  { %s6074_s0 = inlined_call_operand.vmem [shape: f32[96,1], index: 0, kind: input, shape index: {}]   ;;  %s6075_s1 = inlined_call_operand.vmem [shape: f32[96,128], index: 1, kind: input, shape index: {}]   ;;  %s6076_s2 = inlined_call_operand.vmem [shape: f32[96,128], index: 2, kind: input, shape index: {}]   ;;  %s6077_s3 = inlined_call_operand.vmem [shape: f32[1,64], index: 3, kind: input, shape index: {}]   ;;  %s6078_s4 = inlined_call_operand.hbm [shape: f32[1,64], index: 4, kind: input, shape index: {}]   ;;  %s6079_s5 = inlined_call_operand.hbm [shape: bf16[64,64], index: 5, kind: input, shape index: {}]   ;;  %s6080_s6 = inlined_call_operand.hbm [shape: bf16[64,64], index: 6, kind: input, shape index: {}]   ;;  %s6081_s7 = inlined_call_operand.hbm [shape: f32[1,64], index: 7, kind: input, shape index: {}]   ;;  %s6082_s8 = inlined_call_operand.hbm [shape: bf16[64,64], index: 8, kind: input, shape index: {}]   ;;  %s6083_s9 = inlined_call_operand.hbm [shape: f32[1,64], index: 9, kind: input, shape index: {}]   ;;  %s6084_s10 = inlined_call_operand.vmem [shape: bf16[64,64], index: 10, kind: input, shape index: {}]   ;;  %s6085_s11 = inlined_call_operand.hbm [shape: bf16[64,64], index: 11, kind: input, shape index: {}]   ;;  %s6086_s12 = inlined_call_operand.hbm [shape: f32[1,64], index: 12, kind: input, shape index: {}]   ;;  %s6087_s13 = inlined_call_operand.hbm [shape: bf16[64,64], index: 13, kind: input, shape index: {}]   ;;  %s6088_s14 = inlined_call_operand.hbm [shape: f32[1,64], index: 14, kind: input, shape index: {}]   ;;  %s6089_s15 = inlined_call_operand.hbm [shape: bf16[64,64], index: 15, kind: input, shape index: {}]   ;;  %s6090_s16 = inlined_call_operand.hbm [shape: f32[1,64], index: 16, kind: input, shape index: {}]   ;;  %s6091_s17 = inlined_call_operand.hbm [shape: bf16[64,128], index: 17, kind: input, shape index: {}]   ;;  %s6092_s18 = inlined_call_operand.vmem [shape: f32[1,128], index: 18, kind: input, shape index: {}]   ;;  %s6093_s19 = inlined_call_operand.vmem [shape: bf16[128,64], index: 19, kind: input, shape index: {}]   ;;  %s6094_s20 = inlined_call_operand.hbm [shape: bf16[64,64], index: 20, kind: input, shape index: {}]   ;;  %s6095_s21 = inlined_call_operand.vmem [shape: f32[1,64], index: 21, kind: input, shape index: {}]   ;;  %s6096_s22 = inlined_call_operand.hbm [shape: bf16[64,64], index: 22, kind: input, shape index: {}]   ;;  %s6097_s23 = inlined_call_operand.vmem [shape: f32[1,64], index: 23, kind: input, shape index: {}]   ;;  %s6098_s24 = inlined_call_operand.hbm [shape: bf16[64,128], index: 24, kind: input, shape index: {}]   ;;  %s6099_s25 = inlined_call_operand.vmem [shape: f32[1,128], index: 25, kind: input, shape index: {}]   ;;  %s6100_s26 = inlined_call_operand.hbm [shape: f32[96,128], index: 26, kind: output, shape index: {}]  }
   0x1   :  { %6128 = sst [smem:[#allocation47_spill]] %s6074_s0 }
   0x2   :  { %6129 = sst [smem:[#allocation48_spill]] %s6075_s1 }
   0x3   :  { %6130 = sst [smem:[#allocation49_spill]] %s6076_s2 }
   0x4   :  { %6131 = sst [smem:[#allocation50_spill]] %s6077_s3 }
   0x5   :  { %6132 = sst [smem:[#allocation51_spill]] %s6078_s4 }
   0x6   :  { %6133 = sst [smem:[#allocation52_spill]] %s6079_s5 }
   0x7   :  { %6134 = sst [smem:[#allocation53_spill]] %s6080_s6 }
   0x8   :  { %6135 = sst [smem:[#allocation54_spill]] %s6081_s7 }
   0x9   :  { %6136 = sst [smem:[#allocation55_spill]] %s6082_s8 }
   0xa   :  { %6137 = sst [smem:[#allocation56_spill]] %s6083_s9 }
   0xb   :  { %6138 = sst [smem:[#allocation57_spill]] %s6084_s10 }
   0xc   :  { %6139 = sst [smem:[#allocation58_spill]] %s6086_s12 }
   0xd   :  { %6140 = sst [smem:[#allocation59_spill]] %s6088_s14 }
   0xe   :  { %6141 = sst [smem:[#allocation60_spill]] %s6090_s16 }
   0xf   :  { %6142 = sst [smem:[#allocation61_spill]] %s6092_s18 }
  0x10   :  { %6143 = sst [smem:[#allocation62_spill]] %s6095_s21 }
  0x11   :  { %6144 = sst [smem:[#allocation63_spill]] %s6097_s23 }
  0x12   :  { %6145 = sst [smem:[#allocation64_spill]] %s6099_s25 }
  0x13   :  { %6146 = sst [smem:[#allocation65_spill]] %s6100_s26 }
  0x14   :  { %31 = vsyncpa [#allocation3], 0 }
  0x15   :  { %32 = vsyncpa [#allocation6], 0 }
  0x16   :  { %33 = vsyncpa [#allocation9], 0 }
  0x17   :  { %34 = vsyncpa [#allocation12], 0 }
  0x18   :  { %35 = vsyncpa [#allocation15], 0 }
  0x19   :  { %36 = vsyncpa [#allocation18], 0 }
  0x1a   :  { %37 = vsyncpa [#allocation21], 0 }
  0x1b   :  { %38 = vsyncpa [#allocation24], 0 }
  0x1c   :  { %39 = vsyncpa [#allocation27], 0 }
  0x1d   :  { %40 = vsyncpa [#allocation4], 0 }
  0x1e   :  { %42 = vsyncpa [#allocation4 + $0x1], 0  ;;  %s5064_s27 = smov 0   ;;  %s5066_s3 = smov 0  }
  0x1f   :  { %s5068_s7 = smov 0   ;;  %s5070_s28 = smov 0  }
  0x20 LB: > { %6147 = sst [smem:[#allocation39_spill]] %s4887_s27  ;;  %s5085_s8 = sadd.s32 4294967295, %s4899_s28   ;;  %s4899_s28 = sphi %s5070_s28, %s6238_s28   ;;  %s4895_s7 = sphi %s5068_s7, %s6241_s7   ;;  %s4891_s3 = sphi %s5066_s3, %s6240_s3   ;;  %s4887_s27 = sphi %s5064_s27, %s6239_s27  }
  0x21   : > { %6148 = sst [smem:[#allocation40_spill]] %s4891_s3  ;;  %s3594_s4 = sadd.s32 4294967294, %s4899_s28  }
  0x22   : > { %6149 = sst [smem:[#allocation41_spill]] %s4895_s7  ;;  %s5089_s29 = sadd.s32 1, %s4899_s28  }
  0x23   : > { %6150 = sst [smem:[#allocation42_spill]] %s4899_s28  ;;  %s616_s0 = sadd.s32 1, %s4895_s7 }
  0x24   : > { %6151 = sst [smem:[#allocation43_spill]] %s5089_s29  ;;  %s613_s9 = ssub.s32 %s4899_s28, %s5089_s29 }
  0x25   : > { %p626_p0 = scmp.ne.s32.totalorder %s4895_s7, %s4891_s3  ;;  %p614_p1 = scmp.eq.s32.totalorder %s613_s9, 0 }
  0x26   : > { %p627_p2 = scmp.eq.s32.totalorder %s5085_s8, 2  ;;  %p632_p3 = scmp.ne.s32.totalorder %s4891_s3, %s4887_s27 }
  0x27   : > { %p633_p4 = scmp.eq.s32.totalorder %s3594_s4, 2  ;;  %p3595_p7 = scmp.ge.s32.totalorder %s4899_s28, 1 }
  0x28   : > { %s5100_s30 = scalar_select %p614_p1, %s4895_s7, %s616_s0  }
  0x29   : > { %p5102_p5 = por %p627_p2, %p626_p0  ;;  %p5106_p6 = por %p633_p4, %p632_p3 }
  0x2a   : > { %6152 = sst [smem:[#allocation44_spill]] %s5100_s30  ;;  %p640_p8 = scmp.lt.s32.totalorder %s4899_s28, 4 }
  0x2b   : > { %s6153_s2 = scalar_select %p5102_p5, 1, 0 }
  0x2c   : > { %s6155_s5 = scalar_select %p5106_p6, 1, 0 }
  0x2d   : > { %6154 = sst [smem:[#allocation45_spill]] %s6153_s2  ;;  %p6117_p9 = scmp.eq.s32.totalorder %s5085_s8, 0 }
  0x2e   : > { %6156 = sst [smem:[#allocation46_spill]] %s6155_s5  ;;  %p5113_p10 = pnand %p3595_p7, %p640_p8 }
  0x2f   : > { %s4901_s6 = smov [#allocation5]   ;;  %s4902_s0 = smov [#allocation8]  }
  0x30   : > { %s6157_s10 = scalar_select %p5113_p10, 1, 0 }
  0x31   : > { %s666_s1 = sshll.u32 %s4901_s6, 4  ;;  %p4090_p11 = pneg %p5113_p10  ;;  %s5119_s1 = int_to_ptr.vmem [resolvable:$true] %s666_s1 }
  0x32   : > { %s693_s9 = sshll.u32 %s4902_s0, 4  ;;  %s4903_s30 = smov [#allocation11]   ;;  %s5127_s9 = int_to_ptr.vmem [resolvable:$true] %s693_s9 }
  0x33   : > { %p5123_p12 = pnand %p6117_p9, %p4090_p11  ;;  %s5129_s7 = sshll.u32 %s4903_s30, 4  ;;  %s718_s7 = int_to_ptr.vmem [resolvable:$true] %s5129_s7 }
  0x34   : > { %s6159_s6 = sld [smem:[#allocation52_spill]] }
  0x35   : > { %p5139_p0 = pneg %p5123_p12 }
  0x3a   : > { %s4353_s27 = scalar_lea.hbm %s6159_s6, 512 }
  0x3b   : > { %p4354_p13 = scmp.ne.s32.totalorder %s6159_s6, %s4353_s27  ;;  %p4360_p3 = scmp.lt.u32.totalorder %s4353_s27, %s6159_s6 }
  0x3d   : > { %p4356_p1 = pnand %p5139_p0, %p4354_p13 }
  0x3f   : > { %p4357_p2 = pneg %p4356_p1 }
  0x41   : > { %p4362_p4 = pnand %p4360_p3, %p4357_p2 }
  0x43   : > { %4365 = shalt.err (!%p4362_p4)
}
  0x44   : > { %s4366_s26 = scalar_lea.vmem %s5119_s1, 512  ;;  %p4374_p9 = scmp.lt.s32.totalorder %s5119_s1, %s5119_s1 }
  0x45   : > { %p4367_p7 = scmp.ne.s32.totalorder %s5119_s1, %s4366_s26  ;;  %p4375_p6 = scmp.lt.s32.totalorder %s4366_s26, %s4366_s26 }
  0x47   : > { %p4369_p8 = pnand %p4367_p7, %p5139_p0  ;;  %p4376_p13 = por %p4375_p6, %p4374_p9 }
  0x49   : > { %p4370_p11 = pneg %p4369_p8 }
  0x4b   : > { %p4377_p1 = pnand %p4376_p13, %p4370_p11 }
  0x4d   : > { %4380 = shalt.err (!%p4377_p1)
}
  0x4e   : > { %s6122_s28 = smov 64   ;;  %s6124_s27 = smov 4  }
  0x4f   : > { %4096 = dma.hbm_to_vmem [thread:$0]  (!%p5123_p12), %s6159_s6, 512, %s5119_s1, [#allocation6], %s6122_s28, %s6122_s28, %s6124_s27  }
  0x50   : > { %s6161_s25 = sld [smem:[#allocation54_spill]] }
  0x56   : > { %s4381_s26 = scalar_lea.hbm %s6161_s25, 16 }
  0x57   : > { %p4382_p6 = scmp.ne.s32.totalorder %s6161_s25, %s4381_s26  ;;  %p4388_p3 = scmp.lt.u32.totalorder %s4381_s26, %s6161_s25 }
  0x59   : > { %p4384_p9 = pnand %p4382_p6, %p5139_p0 }
  0x5b   : > { %p4385_p2 = pneg %p4384_p9 }
  0x5d   : > { %p4390_p4 = pnand %p4388_p3, %p4385_p2 }
  0x5f   : > { %4393 = shalt.err (!%p4390_p4)
}
  0x60   : > { %s4394_s1 = scalar_lea.vmem %s5127_s9, 16  ;;  %s4401_s18 = scalar_lea.vmem %s5127_s9, 32 }
  0x61   : > { %p4395_p7 = scmp.ne.s32.totalorder %s5127_s9, %s4394_s1  ;;  %p4402_p13 = scmp.lt.s32.totalorder %s5127_s9, %s5127_s9 }
  0x62   : > { %p4403_p1 = scmp.lt.s32.totalorder %s4401_s18, %s4394_s1 }
  0x63   : > { %p4397_p8 = pnand %p4395_p7, %p5139_p0 }
  0x64   : > { %p4404_p6 = por %p4403_p1, %p4402_p13 }
  0x65   : > { %p4398_p11 = pneg %p4397_p8 }
  0x67   : > { %p4405_p9 = pnand %p4404_p6, %p4398_p11 }
  0x69   : > { %4408 = shalt.err (!%p4405_p9)
}
  0x6a   : > { %4102 = dma.hbm_to_vmem [thread:$0]  (!%p5123_p12), %s6161_s25, 16, %s5127_s9, [#allocation9]  }
  0x6b   : > { %s6162_s5 = sld [smem:[#allocation56_spill]] }
  0x71   : > { %s4409_s0 = scalar_lea.hbm %s6162_s5, 16 }
  0x72   : > { %p4410_p2 = scmp.ne.s32.totalorder %s6162_s5, %s4409_s0  ;;  %p4416_p7 = scmp.lt.u32.totalorder %s4409_s0, %s6162_s5 }
  0x74   : > { %p4412_p3 = pnand %p4410_p2, %p5139_p0 }
  0x76   : > { %p4413_p4 = pneg %p4412_p3 }
  0x78   : > { %p4418_p8 = pnand %p4416_p7, %p4413_p4 }
  0x7a   : > { %4421 = shalt.err (!%p4418_p8)
}
  0x7b   : > { %s4422_s21 = scalar_lea.vmem %s718_s7, 16  ;;  %s4429_s9 = scalar_lea.vmem %s718_s7, 32 }
  0x7c   : > { %p4423_p11 = scmp.ne.s32.totalorder %s718_s7, %s4422_s21  ;;  %p4430_p6 = scmp.lt.s32.totalorder %s718_s7, %s718_s7 }
  0x7d   : > { %p4431_p9 = scmp.lt.s32.totalorder %s4429_s9, %s4422_s21 }
  0x7e   : > { %p4425_p13 = pnand %p4423_p11, %p5139_p0 }
  0x7f   : > { %p4432_p5 = por %p4431_p9, %p4430_p6 }
  0x80   : > { %p4426_p1 = pneg %p4425_p13 }
  0x82   : > { %p4433_p10 = pnand %p4432_p5, %p4426_p1 }
  0x84   : > { %4436 = shalt.err (!%p4433_p10)
}
  0x85   : > { %4108 = dma.hbm_to_vmem [thread:$0]  (!%p5123_p12), %s6162_s5, 16, %s718_s7, [#allocation12]  }
  0x86   : > { %s4906_s29 = smov [#allocation14]   ;;  %s4907_s30 = smov [#allocation17]  }
  0x87   : > { %s744_s0 = sshll.u32 %s4906_s29, 4  ;;  %s768_s26 = sshll.u32 %s4907_s30, 4  ;;  %s745_s0 = int_to_ptr.vmem [resolvable:$true] %s744_s0  ;;  %s769_s26 = int_to_ptr.vmem [resolvable:$true] %s768_s26 }
  0x88   : > { %s6163_s12 = sld [smem:[#allocation58_spill]] }
  0x8e   : > { %s4437_s28 = scalar_lea.hbm %s6163_s12, 16 }
  0x8f   : > { %p4438_p5 = scmp.ne.s32.totalorder %s6163_s12, %s4437_s28  ;;  %p4444_p3 = scmp.lt.u32.totalorder %s4437_s28, %s6163_s12 }
  0x91   : > { %p4440_p10 = pnand %p4438_p5, %p5139_p0 }
  0x93   : > { %p4441_p2 = pneg %p4440_p10 }
  0x95   : > { %p4446_p4 = pnand %p4444_p3, %p4441_p2 }
  0x97   : > { %4449 = shalt.err (!%p4446_p4)
}
  0x98   : > { %s4450_s7 = scalar_lea.vmem %s745_s0, 16  ;;  %s4457_s3 = scalar_lea.vmem %s745_s0, 32 }
  0x99   : > { %p4451_p7 = scmp.ne.s32.totalorder %s745_s0, %s4450_s7  ;;  %p4458_p13 = scmp.lt.s32.totalorder %s745_s0, %s745_s0 }
  0x9a   : > { %p4459_p1 = scmp.lt.s32.totalorder %s4457_s3, %s4450_s7 }
  0x9b   : > { %p4453_p8 = pnand %p4451_p7, %p5139_p0 }
  0x9c   : > { %p4460_p6 = por %p4459_p1, %p4458_p13 }
  0x9d   : > { %p4454_p11 = pneg %p4453_p8 }
  0x9f   : > { %p4461_p9 = pnand %p4460_p6, %p4454_p11 }
  0xa1   : > { %4464 = shalt.err (!%p4461_p9)
}
  0xa2   : > { %4114 = dma.hbm_to_vmem [thread:$0]  (!%p5123_p12), %s6163_s12, 16, %s745_s0, [#allocation15]  }
  0xa3   : > { %s6164_s14 = sld [smem:[#allocation59_spill]] }
  0xa9   : > { %s4465_s1 = scalar_lea.hbm %s6164_s14, 16 }
  0xaa   : > { %p4466_p5 = scmp.ne.s32.totalorder %s6164_s14, %s4465_s1  ;;  %p4472_p3 = scmp.lt.u32.totalorder %s4465_s1, %s6164_s14 }
  0xac   : > { %p4468_p10 = pnand %p4466_p5, %p5139_p0 }
  0xae   : > { %p4469_p2 = pneg %p4468_p10 }
  0xb0   : > { %p4474_p4 = pnand %p4472_p3, %p4469_p2 }
  0xb2   : > { %4477 = shalt.err (!%p4474_p4)
}
  0xb3   : > { %s4478_s7 = scalar_lea.vmem %s769_s26, 16  ;;  %s4485_s0 = scalar_lea.vmem %s769_s26, 32 }
  0xb4   : > { %p4479_p7 = scmp.ne.s32.totalorder %s769_s26, %s4478_s7  ;;  %p4486_p13 = scmp.lt.s32.totalorder %s769_s26, %s769_s26 }
  0xb5   : > { %p4487_p1 = scmp.lt.s32.totalorder %s4485_s0, %s4478_s7 }
  0xb6   : > { %p4481_p8 = pnand %p4479_p7, %p5139_p0 }
  0xb7   : > { %p4488_p6 = por %p4487_p1, %p4486_p13 }
  0xb8   : > { %p4482_p11 = pneg %p4481_p8 }
  0xba   : > { %p4489_p9 = pnand %p4488_p6, %p4482_p11 }
  0xbc   : > { %4492 = shalt.err (!%p4489_p9)
}
  0xbd   : > { %4120 = dma.hbm_to_vmem [thread:$0]  (!%p5123_p12), %s6164_s14, 16, %s769_s26, [#allocation18]  }
  0xbe   : > { %s4908_s30 = smov [#allocation20]   ;;  %s4909_s27 = smov [#allocation23]  }
  0xbf   : > { %s792_s28 = sshll.u32 %s4908_s30, 4  ;;  %s821_s1 = sshll.u32 %s4909_s27, 4  ;;  %s793_s28 = int_to_ptr.vmem [resolvable:$true] %s792_s28  ;;  %s822_s1 = int_to_ptr.vmem [resolvable:$true] %s821_s1 }
  0xc0   : > { %s6165_s16 = sld [smem:[#allocation60_spill]] }
  0xc6   : > { %s4493_s9 = scalar_lea.hbm %s6165_s16, 16 }
  0xc7   : > { %p4494_p5 = scmp.ne.s32.totalorder %s6165_s16, %s4493_s9  ;;  %p4500_p3 = scmp.lt.u32.totalorder %s4493_s9, %s6165_s16 }
  0xc9   : > { %p4496_p10 = pnand %p4494_p5, %p5139_p0 }
  0xcb   : > { %p4497_p2 = pneg %p4496_p10 }
  0xcd   : > { %p4502_p4 = pnand %p4500_p3, %p4497_p2 }
  0xcf   : > { %4505 = shalt.err (!%p4502_p4)
}
  0xd0   : > { %s4506_s26 = scalar_lea.vmem %s793_s28, 16  ;;  %s4513_s29 = scalar_lea.vmem %s793_s28, 32 }
  0xd1   : > { %p4507_p7 = scmp.ne.s32.totalorder %s793_s28, %s4506_s26  ;;  %p4514_p13 = scmp.lt.s32.totalorder %s793_s28, %s793_s28 }
  0xd2   : > { %p4515_p1 = scmp.lt.s32.totalorder %s4513_s29, %s4506_s26 }
  0xd3   : > { %p4509_p8 = pnand %p4507_p7, %p5139_p0 }
  0xd4   : > { %p4516_p6 = por %p4515_p1, %p4514_p13 }
  0xd5   : > { %p4510_p11 = pneg %p4509_p8 }
  0xd7   : > { %p4517_p9 = pnand %p4516_p6, %p4510_p11 }
  0xd9   : > { %4520 = shalt.err (!%p4517_p9)
}
  0xda   : > { %4126 = dma.hbm_to_vmem [thread:$0]  (!%p5123_p12), %s6165_s16, 16, %s793_s28, [#allocation21]  }
  0xdb   : > { %s4521_s9 = scalar_lea.hbm %s6094_s20, 512 }
  0xdc   : > { %p4522_p5 = scmp.ne.s32.totalorder %s6094_s20, %s4521_s9  ;;  %p4528_p3 = scmp.lt.u32.totalorder %s4521_s9, %s6094_s20 }
  0xde   : > { %p4524_p10 = pnand %p4522_p5, %p5139_p0 }
  0xe0   : > { %p4525_p2 = pneg %p4524_p10 }
  0xe2   : > { %p4530_p4 = pnand %p4528_p3, %p4525_p2 }
  0xe4   : > { %4533 = shalt.err (!%p4530_p4)
}
  0xe5   : > { %s4534_s26 = scalar_lea.vmem %s822_s1, 512  ;;  %p4542_p13 = scmp.lt.s32.totalorder %s822_s1, %s822_s1 }
  0xe6   : > { %p4535_p7 = scmp.ne.s32.totalorder %s822_s1, %s4534_s26  ;;  %p4543_p1 = scmp.lt.s32.totalorder %s4534_s26, %s4534_s26 }
  0xe8   : > { %p4537_p8 = pnand %p4535_p7, %p5139_p0  ;;  %p4544_p6 = por %p4543_p1, %p4542_p13 }
  0xea   : > { %p4538_p11 = pneg %p4537_p8 }
  0xec   : > { %p4545_p9 = pnand %p4544_p6, %p4538_p11 }
  0xee   : > { %4548 = shalt.err (!%p4545_p9)
}
  0xef   : > { %s6166_s28 = smov 4   ;;  %s6167_s29 = smov 64  }
  0xf0   : > { %4132 = dma.hbm_to_vmem [thread:$0]  (!%p5123_p12), %s6094_s20, 512, %s822_s1, [#allocation24], %s6167_s29, %s6167_s29, %s6166_s28  }
  0xf1   : > { %s4910_s18 = smov [#allocation2]   ;;  %s4911_s9 = smov [#allocation7]  }
  0xf2   : > { %s656_s21 = sshll.u32 %s4910_s18, 4  ;;  %s679_s23 = sshll.u32 %s4911_s9, 4  ;;  %s657_s21 = int_to_ptr.vmem [resolvable:$true] %s656_s21  ;;  %s680_s23 = int_to_ptr.vmem [resolvable:$true] %s679_s23 }
  0xf3   : > { %s6168_s3 = sld [smem:[#allocation51_spill]] }
  0xf9   : > { %s6169_s26 = smov %s6168_s3  ;;  %s4549_s5 = scalar_lea.hbm %s6168_s3, 16 }
  0xfa   : > { %p4550_p5 = scmp.ne.s32.totalorder %s6169_s26, %s4549_s5  ;;  %p4556_p3 = scmp.lt.u32.totalorder %s4549_s5, %s6169_s26 }
  0xfc   : > { %p4552_p10 = pnand %p4550_p5, %p5139_p0 }
  0xfe   : > { %p4553_p2 = pneg %p4552_p10 }
 0x100   : > { %p4558_p4 = pnand %p4556_p3, %p4553_p2 }
 0x102   : > { %4561 = shalt.err (!%p4558_p4)
}
 0x103   : > { %s4562_s1 = scalar_lea.vmem %s657_s21, 16  ;;  %s4569_s27 = scalar_lea.vmem %s657_s21, 32 }
 0x104   : > { %p4563_p7 = scmp.ne.s32.totalorder %s657_s21, %s4562_s1  ;;  %p4570_p13 = scmp.lt.s32.totalorder %s657_s21, %s657_s21 }
 0x105   : > { %p4571_p1 = scmp.lt.s32.totalorder %s4569_s27, %s4562_s1 }
 0x106   : > { %p4565_p8 = pnand %p4563_p7, %p5139_p0 }
 0x107   : > { %p4572_p6 = por %p4571_p1, %p4570_p13 }
 0x108   : > { %p4566_p11 = pneg %p4565_p8 }
 0x10a   : > { %p4573_p9 = pnand %p4572_p6, %p4566_p11 }
 0x10c   : > { %4576 = shalt.err (!%p4573_p9)
}
 0x10d   : > { %4093 = dma.hbm_to_vmem [thread:$0]  (!%p5123_p12), %s6169_s26, 16, %s657_s21, [#allocation3]  }
 0x10e   : > { %s6170_s18 = sld [smem:[#allocation53_spill]] }
 0x114   : > { %s4577_s9 = scalar_lea.hbm %s6170_s18, 512 }
 0x115   : > { %p4578_p5 = scmp.ne.s32.totalorder %s6170_s18, %s4577_s9  ;;  %p4584_p3 = scmp.lt.u32.totalorder %s4577_s9, %s6170_s18 }
 0x117   : > { %p4580_p10 = pnand %p4578_p5, %p5139_p0 }
 0x119   : > { %p4581_p2 = pneg %p4580_p10 }
 0x11b   : > { %p4586_p4 = pnand %p4584_p3, %p4581_p2 }
 0x11d   : > { %4589 = shalt.err (!%p4586_p4)
}
 0x11e   : > { %s4590_s1 = scalar_lea.vmem %s680_s23, 512  ;;  %p4598_p13 = scmp.lt.s32.totalorder %s680_s23, %s680_s23 }
 0x11f   : > { %p4591_p7 = scmp.ne.s32.totalorder %s680_s23, %s4590_s1  ;;  %p4599_p1 = scmp.lt.s32.totalorder %s4590_s1, %s4590_s1 }
 0x121   : > { %p4593_p8 = pnand %p4591_p7, %p5139_p0  ;;  %p4600_p6 = por %p4599_p1, %p4598_p13 }
 0x123   : > { %p4594_p11 = pneg %p4593_p8 }
 0x125   : > { %p4601_p9 = pnand %p4600_p6, %p4594_p11 }
 0x127   : > { %4604 = shalt.err (!%p4601_p9)
}
 0x128   : > { %4099 = dma.hbm_to_vmem [thread:$0]  (!%p5123_p12), %s6170_s18, 512, %s680_s23, [#allocation6], %s6167_s29, %s6167_s29, %s6166_s28  }
 0x129   : > { %s4912_s12 = smov [#allocation10]   ;;  %s4913_s14 = smov [#allocation13]  }
 0x12a   : > { %s703_s6 = sshll.u32 %s4912_s12, 4  ;;  %s730_s5 = sshll.u32 %s4913_s14, 4  ;;  %s704_s6 = int_to_ptr.vmem [resolvable:$true] %s703_s6  ;;  %s731_s5 = int_to_ptr.vmem [resolvable:$true] %s730_s5 }
 0x12b   : > { %s6171_s0 = sld [smem:[#allocation55_spill]] }
 0x131   : > { %s4605_s3 = scalar_lea.hbm %s6171_s0, 512 }
 0x132   : > { %p4606_p5 = scmp.ne.s32.totalorder %s6171_s0, %s4605_s3  ;;  %p4612_p3 = scmp.lt.u32.totalorder %s4605_s3, %s6171_s0 }
 0x134   : > { %p4608_p10 = pnand %p4606_p5, %p5139_p0 }
 0x136   : > { %p4609_p2 = pneg %p4608_p10 }
 0x138   : > { %p4614_p4 = pnand %p4612_p3, %p4609_p2 }
 0x13a   : > { %4617 = shalt.err (!%p4614_p4)
}
 0x13b   : > { %s4618_s23 = scalar_lea.vmem %s704_s6, 512  ;;  %p4626_p13 = scmp.lt.s32.totalorder %s704_s6, %s704_s6 }
 0x13c   : > { %p4619_p7 = scmp.ne.s32.totalorder %s704_s6, %s4618_s23  ;;  %p4627_p1 = scmp.lt.s32.totalorder %s4618_s23, %s4618_s23 }
 0x13e   : > { %p4621_p8 = pnand %p4619_p7, %p5139_p0  ;;  %p4628_p6 = por %p4627_p1, %p4626_p13 }
 0x140   : > { %p4622_p11 = pneg %p4621_p8 }
 0x142   : > { %p4629_p9 = pnand %p4628_p6, %p4622_p11 }
 0x144   : > { %4632 = shalt.err (!%p4629_p9)
}
 0x145   : > { %4105 = dma.hbm_to_vmem [thread:$0]  (!%p5123_p12), %s6171_s0, 512, %s704_s6, [#allocation9], %s6167_s29, %s6167_s29, %s6166_s28  }
 0x146   : > { %s4633_s9 = scalar_lea.hbm %s6085_s11, 512 }
 0x147   : > { %p4634_p5 = scmp.ne.s32.totalorder %s6085_s11, %s4633_s9  ;;  %p4640_p3 = scmp.lt.u32.totalorder %s4633_s9, %s6085_s11 }
 0x149   : > { %p4636_p10 = pnand %p4634_p5, %p5139_p0 }
 0x14b   : > { %p4637_p2 = pneg %p4636_p10 }
 0x14d   : > { %p4642_p4 = pnand %p4640_p3, %p4637_p2 }
 0x14f   : > { %4645 = shalt.err (!%p4642_p4)
}
 0x150   : > { %s4646_s21 = scalar_lea.vmem %s731_s5, 512  ;;  %p4654_p13 = scmp.lt.s32.totalorder %s731_s5, %s731_s5 }
 0x151   : > { %p4647_p7 = scmp.ne.s32.totalorder %s731_s5, %s4646_s21  ;;  %p4655_p1 = scmp.lt.s32.totalorder %s4646_s21, %s4646_s21 }
 0x153   : > { %p4649_p8 = pnand %p4647_p7, %p5139_p0  ;;  %p4656_p6 = por %p4655_p1, %p4654_p13 }
 0x155   : > { %p4650_p11 = pneg %p4649_p8 }
 0x157   : > { %p4657_p9 = pnand %p4656_p6, %p4650_p11 }
 0x159   : > { %4660 = shalt.err (!%p4657_p9)
}
 0x15a   : > { %4111 = dma.hbm_to_vmem [thread:$0]  (!%p5123_p12), %s6085_s11, 512, %s731_s5, [#allocation12], %s6167_s29, %s6167_s29, %s6166_s28  }
 0x15b   : > { %s4914_s16 = smov [#allocation16]   ;;  %s4915_s12 = smov [#allocation19]  }
 0x15c   : > { %s754_s27 = sshll.u32 %s4914_s16, 4  ;;  %s778_s14 = sshll.u32 %s4915_s12, 4  ;;  %s755_s27 = int_to_ptr.vmem [resolvable:$true] %s754_s27  ;;  %s779_s14 = int_to_ptr.vmem [resolvable:$true] %s778_s14 }
 0x15d   : > { %s4661_s3 = scalar_lea.hbm %s6087_s13, 512 }
 0x15e   : > { %p4662_p5 = scmp.ne.s32.totalorder %s6087_s13, %s4661_s3  ;;  %p4668_p3 = scmp.lt.u32.totalorder %s4661_s3, %s6087_s13 }
 0x160   : > { %p4664_p10 = pnand %p4662_p5, %p5139_p0 }
 0x162   : > { %p4665_p2 = pneg %p4664_p10 }
 0x164   : > { %p4670_p4 = pnand %p4668_p3, %p4665_p2 }
 0x166   : > { %4673 = shalt.err (!%p4670_p4)
}
 0x167   : > { %s4674_s5 = scalar_lea.vmem %s755_s27, 512  ;;  %p4682_p13 = scmp.lt.s32.totalorder %s755_s27, %s755_s27 }
 0x168   : > { %p4675_p7 = scmp.ne.s32.totalorder %s755_s27, %s4674_s5  ;;  %p4683_p1 = scmp.lt.s32.totalorder %s4674_s5, %s4674_s5 }
 0x16a   : > { %p4677_p8 = pnand %p4675_p7, %p5139_p0  ;;  %p4684_p6 = por %p4683_p1, %p4682_p13 }
 0x16c   : > { %p4678_p11 = pneg %p4677_p8 }
 0x16e   : > { %p4685_p9 = pnand %p4684_p6, %p4678_p11 }
 0x170   : > { %4688 = shalt.err (!%p4685_p9)
}
 0x171   : > { %4117 = dma.hbm_to_vmem [thread:$0]  (!%p5123_p12), %s6087_s13, 512, %s755_s27, [#allocation15], %s6167_s29, %s6167_s29, %s6166_s28  }
 0x172   : > { %s4689_s7 = scalar_lea.hbm %s6089_s15, 512 }
 0x173   : > { %p4690_p5 = scmp.ne.s32.totalorder %s6089_s15, %s4689_s7  ;;  %p4696_p3 = scmp.lt.u32.totalorder %s4689_s7, %s6089_s15 }
 0x175   : > { %p4692_p10 = pnand %p4690_p5, %p5139_p0 }
 0x177   : > { %p4693_p2 = pneg %p4692_p10 }
 0x179   : > { %p4698_p4 = pnand %p4696_p3, %p4693_p2 }
 0x17b   : > { %4701 = shalt.err (!%p4698_p4)
}
 0x17c   : > { %s4702_s6 = scalar_lea.vmem %s779_s14, 512  ;;  %p4710_p13 = scmp.lt.s32.totalorder %s779_s14, %s779_s14 }
 0x17d   : > { %p4703_p7 = scmp.ne.s32.totalorder %s779_s14, %s4702_s6  ;;  %p4711_p1 = scmp.lt.s32.totalorder %s4702_s6, %s4702_s6 }
 0x17f   : > { %p4705_p8 = pnand %p4703_p7, %p5139_p0  ;;  %p4712_p6 = por %p4711_p1, %p4710_p13 }
 0x181   : > { %p4706_p11 = pneg %p4705_p8 }
 0x183   : > { %p4713_p9 = pnand %p4712_p6, %p4706_p11 }
 0x185   : > { %4716 = shalt.err (!%p4713_p9)
}
 0x186   : > { %4123 = dma.hbm_to_vmem [thread:$0]  (!%p5123_p12), %s6089_s15, 512, %s779_s14, [#allocation18], %s6167_s29, %s6167_s29, %s6166_s28  }
 0x187   : > { %s4916_s23 = smov [#allocation22]   ;;  %s4917_s12 = smov [#allocation25]  }
 0x188   : > { %s802_s16 = sshll.u32 %s4916_s23, 4  ;;  %s837_s9 = sshll.u32 %s4917_s12, 4  ;;  %s803_s16 = int_to_ptr.vmem [resolvable:$true] %s802_s16  ;;  %s838_s9 = int_to_ptr.vmem [resolvable:$true] %s837_s9 }
 0x189   : > { %s4717_s30 = scalar_lea.hbm %s6091_s17, 512 }
 0x18a   : > { %p4718_p5 = scmp.ne.s32.totalorder %s6091_s17, %s4717_s30  ;;  %p4724_p3 = scmp.lt.u32.totalorder %s4717_s30, %s6091_s17 }
 0x18c   : > { %p4720_p10 = pnand %p4718_p5, %p5139_p0 }
 0x18e   : > { %p4721_p2 = pneg %p4720_p10 }
 0x190   : > { %p4726_p4 = pnand %p4724_p3, %p4721_p2 }
 0x192   : > { %4729 = shalt.err (!%p4726_p4)
}
 0x193   : > { %s4730_s14 = scalar_lea.vmem %s803_s16, 512  ;;  %p4738_p13 = scmp.lt.s32.totalorder %s803_s16, %s803_s16 }
 0x194   : > { %p4731_p7 = scmp.ne.s32.totalorder %s803_s16, %s4730_s14  ;;  %p4739_p1 = scmp.lt.s32.totalorder %s4730_s14, %s4730_s14 }
 0x196   : > { %p4733_p8 = pnand %p4731_p7, %p5139_p0  ;;  %p4740_p6 = por %p4739_p1, %p4738_p13 }
 0x198   : > { %p4734_p11 = pneg %p4733_p8 }
 0x19a   : > { %p4741_p9 = pnand %p4740_p6, %p4734_p11 }
 0x19c   : > { %4744 = shalt.err (!%p4741_p9)
}
 0x19d   : > { %4129 = dma.hbm_to_vmem [thread:$0]  (!%p5123_p12), %s6091_s17, 512, %s803_s16, [#allocation21], %s6167_s29, %s6167_s29, %s6166_s28  }
 0x19e   : > { %s4745_s3 = scalar_lea.hbm %s6096_s22, 512 }
 0x19f   : > { %p4746_p5 = scmp.ne.s32.totalorder %s6096_s22, %s4745_s3  ;;  %p4752_p3 = scmp.lt.u32.totalorder %s4745_s3, %s6096_s22 }
 0x1a1   : > { %p4748_p10 = pnand %p4746_p5, %p5139_p0 }
 0x1a3   : > { %p4749_p2 = pneg %p4748_p10 }
 0x1a5   : > { %p4754_p4 = pnand %p4752_p3, %p4749_p2 }
 0x1a7   : > { %4757 = shalt.err (!%p4754_p4)
}
 0x1a8   : > { %s4758_s27 = scalar_lea.vmem %s838_s9, 512  ;;  %p4766_p13 = scmp.lt.s32.totalorder %s838_s9, %s838_s9 }
 0x1a9   : > { %p4759_p7 = scmp.ne.s32.totalorder %s838_s9, %s4758_s27  ;;  %p4767_p1 = scmp.lt.s32.totalorder %s4758_s27, %s4758_s27 }
 0x1ab   : > { %p4761_p8 = pnand %p4759_p7, %p5139_p0  ;;  %p4768_p6 = por %p4767_p1, %p4766_p13 }
 0x1ad   : > { %p4762_p11 = pneg %p4761_p8 }
 0x1af   : > { %p4769_p9 = pnand %p4768_p6, %p4762_p11 }
 0x1b1   : > { %4772 = shalt.err (!%p4769_p9)
}
 0x1b2   : > { %4135 = dma.hbm_to_vmem [thread:$0]  (!%p5123_p12), %s6096_s22, 512, %s838_s9, [#allocation24], %s6167_s29, %s6167_s29, %s6166_s28  }
 0x1b3   : > { %s4918_s5 = smov [#allocation26]   ;;  %s4773_s3 = scalar_lea.hbm %s6098_s24, 512 }
 0x1b4   : > { %s853_s23 = sshll.u32 %s4918_s5, 4  ;;  %p4774_p5 = scmp.ne.s32.totalorder %s6098_s24, %s4773_s3  ;;  %s854_s23 = int_to_ptr.vmem [resolvable:$true] %s853_s23 }
 0x1b5   : > { %p4780_p3 = scmp.lt.u32.totalorder %s4773_s3, %s6098_s24 }
 0x1b6   : > { %p4776_p10 = pnand %p4774_p5, %p5139_p0 }
 0x1b8   : > { %p4777_p2 = pneg %p4776_p10 }
 0x1ba   : > { %p4782_p4 = pnand %p4780_p3, %p4777_p2 }
 0x1bc   : > { %4785 = shalt.err (!%p4782_p4)
}
 0x1bd   : > { %s4786_s9 = scalar_lea.vmem %s854_s23, 512  ;;  %p4794_p13 = scmp.lt.s32.totalorder %s854_s23, %s854_s23 }
 0x1be   : > { %p4787_p7 = scmp.ne.s32.totalorder %s854_s23, %s4786_s9  ;;  %p4795_p1 = scmp.lt.s32.totalorder %s4786_s9, %s4786_s9 }
 0x1c0   : > { %p4789_p8 = pnand %p4787_p7, %p5139_p0  ;;  %p4796_p6 = por %p4795_p1, %p4794_p13 }
 0x1c2   : > { %p4790_p11 = pneg %p4789_p8 }
 0x1c4   : > { %p4797_p9 = pnand %p4796_p6, %p4790_p11 }
 0x1c6   : > { %4800 = shalt.err (!%p4797_p9)
}
 0x1c7   : > { %4138 = dma.hbm_to_vmem [thread:$0]  (!%p5123_p12), %s6098_s24, 512, %s854_s23, [#allocation27], %s6167_s29, %s6167_s29, %s6166_s28  }
 0x1c8   : > { %p6172_p5 = scmp.ne.s32.totalorder %s6157_s10, 0 }
 0x1c9   : > { %p6173_p0 = scmp.eq.s32.totalorder (!%p6172_p5), %s5085_s8, 0 }
 0x1ca   : > { %899 = sbr.rel (%p6172_p5) target bundleno = 2321 (0x911), region = 124 }
 0x1d1   : > { %4846 = dma.done.wait (%p6173_p0), [#allocation3], 16   ;;  %p6174_p10 = pmov %p6173_p0 }
 0x1d2   : > { %p6175_p2 = pmov %p6173_p0 }
 0x1d3   : > { %4848 = vsyncadd (%p6174_p10), [#allocation3], 4294967280 }
 0x1d4   : > { %4850 = dma.done.wait (%p6175_p2), [#allocation6], 1024   ;;  %p6176_p3 = pmov %p6173_p0 }
 0x1d5   : > { %p6177_p4 = pmov %p6173_p0 }
 0x1d6   : > { %4852 = vsyncadd (%p6176_p3), [#allocation6], 4294966272 }
 0x1d7   : > { %4854 = dma.done.wait (%p6177_p4), [#allocation9], 528   ;;  %p6178_p12 = pmov %p6173_p0 }
 0x1d8   : > { %p6179_p7 = pmov %p6173_p0 }
 0x1d9   : > { %4856 = vsyncadd (%p6178_p12), [#allocation9], 4294966768 }
 0x1da   : > { %4858 = dma.done.wait (%p6179_p7), [#allocation12], 528   ;;  %p6180_p8 = pmov %p6173_p0 }
 0x1db   : > { %p6181_p11 = pmov %p6173_p0 }
 0x1dc   : > { %4860 = vsyncadd (%p6180_p8), [#allocation12], 4294966768 }
 0x1dd   : > { %4862 = dma.done.wait (%p6181_p11), [#allocation15], 528   ;;  %p6182_p13 = pmov %p6173_p0 }
 0x1de   : > { %p6183_p1 = pmov %p6173_p0 }
 0x1df   : > { %4864 = vsyncadd (%p6182_p13), [#allocation15], 4294966768 }
 0x1e0   : > { %4866 = dma.done.wait (%p6183_p1), [#allocation18], 528   ;;  %p6184_p6 = pmov %p6173_p0 }
 0x1e1   : > { %p6185_p9 = pmov %p6173_p0 }
 0x1e2   : > { %4868 = vsyncadd (%p6184_p6), [#allocation18], 4294966768 }
 0x1e3   : > { %4870 = dma.done.wait (%p6185_p9), [#allocation21], 528   ;;  %p6186_p5 = pmov %p6173_p0 }
 0x1e5   : > { %4872 = vsyncadd (%p6186_p5), [#allocation21], 4294966768 }
 0x1e6   : > { %4874 = dma.done.wait (%p6173_p0), [#allocation24], 1024   ;;  %p6187_p10 = pmov %p6173_p0 }
 0x1e7   : > { %p6188_p2 = pmov %p6173_p0 }
 0x1e8   : > { %4876 = vsyncadd (%p6187_p10), [#allocation24], 4294966272 }
 0x1e9   : > { %4878 = dma.done.wait (%p6188_p2), [#allocation27], 512   ;;  %p6189_p3 = pmov %p6173_p0 }
 0x1ea   : > { %s3631_s2 = sshll.u32 %s5085_s8, 2  ;;  %v4919_v0 = vmov 0   ;;  %s6190_s29 = sld [smem:[#allocation47_spill]]  ;;  %v4237_v5 = vld [vmem:[#allocation7] sm:$0xff]   ;;  %v4238_v6 = vld [vmem:[#allocation7 + $0x8] sm:$0xff]   ;;  %v4239_v7 = vld [vmem:[#allocation7 + $0x10] sm:$0xff]  }
 0x1eb   : > { %4880 = vsyncadd (%p6189_p3), [#allocation27], 4294966784  ;;  %4236 = vset.pattern.permute.xlu1 %v4919_v0  ;;  %4235 = vset.pattern.permute.xlu0 %v4919_v0  ;;  %p1040_p4 = scmp.lt.s32.totalorder %s3631_s2, 11  ;;  %v4240_v8 = vld [vmem:[#allocation7 + $0x18] sm:$0xff]   ;;  %s6191_s12 = sld [smem:[#allocation50_spill]]  ;;  %v5528_v31 = vld [vmem:[#allocation5] sm:$0xff]  }
 0x1ec   : > { %3844 = vmatprep.subr.bf16.mxu0 %v4237_v5  ;;  %v3638_v10 = vld [vmem:[#allocation2] ss:$0 sm:$0xff]  ;;  %v4920_v47 = vmov 683565275   ;;  %v4921_v49 = vmov 2475754826  }
 0x1ed   : > { %s6243_s2 = smov (!%p1040_p4, %s3631_s2), 11  ;;  %3845 = vmatpush3.bf16.msra.mxu0 %v4237_v5  ;;  %v4922_v53 = vmov 2131351028   ;;  %v4923_v56 = vmov 2102212464   ;;  %s6209_s30 = sld [smem:[#allocation57_spill]] }
 0x1ee   : > { %s5506_s10 = sshll.u32 %s6243_s2, 3  ;;  %3846 = vmatprep.subr.bf16.mxu0 %v4238_v6  ;;  %v4924_v59 = vmov 920167782   ;;  %v4925_v62 = vmov 1326507024   ;;  %s6217_s28 = sld [smem:[#allocation48_spill]] }
 0x1ef   : > { %s6221_s23 = sld [smem:[#allocation62_spill]]  ;;  %s6224_s3 = sld [smem:[#allocation63_spill]] }
 0x1f0   : > { %s1043_s14 = scalar_lea.vmem %s6190_s29, %s5506_s10  ;;  %s6225_s1 = sld [smem:[#allocation40_spill]] }
 0x1f1   : > { %v1061_v1 = vld [vmem:[%s1043_s14 + $0x10] sm:$0xff]  ;;  %v1059_v2 = vld [vmem:[%s1043_s14] sm:$0xff]  ;;  %v1062_v3 = vld [vmem:[%s1043_s14 + $0x18] sm:$0xff]  ;;  %3847 = vmatpush3.bf16.msra.mxu0 %v4238_v6  ;;  %s6228_s9 = sld [smem:[#allocation49_spill]]  ;;  %s6229_s4 = sld [smem:[#allocation61_spill]] }
 0x1f2   : > { %1082 = vperm.xlu1 %4236, %v1061_v1   ;;  %1072 = vperm.xlu0 %4235, %v1059_v2   ;;  %v1060_v4 = vld [vmem:[%s1043_s14 + $0x8] sm:$0xff]  ;;  %v3637_v9 = vld [vmem:[%s6191_s12] ss:$0 sm:$0xff]  ;;  %s6230_s5 = sld [smem:[#allocation64_spill]]  ;;  %s4926_s2 = smov [#allocation28]  }
 0x1f3   : > { %3848 = vmatprep.subr.bf16.mxu0 %v4239_v7  ;;  %s6231_s7 = sld [smem:[#allocation45_spill]] }
 0x1f4   : > { %s5952_s29 = scalar_lea.vmem %s6217_s28, %s5506_s10 }
 0x1f5   : > { %3849 = vmatpush3.bf16.msra.mxu0 %v4239_v7 }
 0x1f6   : > { %1087 = vperm.xlu1 %4236, %v1062_v3   ;;  %1077 = vperm.xlu0 %4235, %v1060_v4   ;;  %s1036_s28 = sand.u32 1, %s6225_s1  }
 0x1f7   : > { %3850 = vmatprep.subr.bf16.mxu0 %v4240_v8  ;;  %s1055_s27 = scalar_lea.vmem %s6228_s9, %s5506_s10  ;;  %s3630_s10 = sshll.u32 %s1036_s28, 5 }
 0x1f8   : > { %s6232_s9 = sld [smem:[#allocation65_spill]] }
 0x1f9   : > { %3851 = vmatpush3.bf16.msra.mxu0 %v4240_v8  ;;  %p6233_p7 = scmp.ne.s32.totalorder %s6231_s7, 0 }
 0x1fa   : > { %3856 = vmatprep.subr.bf16.mxu0 %v5528_v31 }
 0x271   : > { %v1083_v11 = vpop.permute.xlu1 %1082  ;;  %v1073_v12 = vpop.permute.xlu0 %1072 }
 0x272   : > { %v1092_v13 = vmul.f32 %v3637_v9, %v1083_v11  ;;  %v1090_v14 = vmul.f32 %v3637_v9, %v1073_v12 }
 0x274   : > { %v5515_v15 = vadd.f32 %v3638_v10, %v1092_v13  ;;  %v5517_v16 = vadd.f32 %v3638_v10, %v1090_v14 }
 0x275   : > { %v1088_v17 = vpop.permute.xlu1 %1087  ;;  %v1078_v18 = vpop.permute.xlu0 %1077 }
 0x276   : > { %v1313_v19 = vand.u32 2147483647, %v5515_v15  ;;  %v1316_v20 = vand.u32 2139095040, %v5515_v15  ;;  %v1108_v21 = vand.u32 2139095040, %v5517_v16  ;;  %v1093_v22 = vmul.f32 %v3637_v9, %v1088_v17 }
 0x277   : > { %v1091_v23 = vmul.f32 %v3637_v9, %v1078_v18 }
 0x278   : > { %v1317_v24 = vshrl.u32 %v1316_v20, 23  ;;  %v1109_v25 = vshrl.u32 %v1108_v21, 23  ;;  %v1320_v26 = vand.u32 8388607, %v1313_v19  ;;  %v5524_v27 = vadd.f32 %v3638_v10, %v1093_v22 }
 0x279   : > { %v5526_v30 = vadd.f32 %v3638_v10, %v1091_v23 }
 0x27a   : > { %v3647_v28 = vadd.s32 4294967169, %v1317_v24  ;;  %v3639_v29 = vadd.s32 4294967169, %v1109_v25  ;;  %v1420_v32 = vand.u32 2139095040, %v5524_v27  ;;  %v1321_v35 = vor.u32 8388608, %v1320_v26 }
 0x27b   : > { %v1417_v36 = vand.u32 2147483647, %v5524_v27  ;;  %v1212_v37 = vand.u32 2139095040, %v5526_v30 }
 0x27c   : > { %v1323_v33 = vadd.s32 1, %v3647_v28  ;;  %v1115_v34 = vadd.s32 1, %v3639_v29  ;;  %v1421_v39 = vshrl.u32 %v1420_v32, 23  ;;  %v5534_v41 = vshll.u32 %v1321_v35, 8 }
 0x27d   : > { %v1424_v44 = vand.u32 8388607, %v1417_v36  ;;  %v1213_v45 = vshrl.u32 %v1212_v37, 23  ;;  %v1105_v35 = vand.u32 2147483647, %v5517_v16 }
 0x27e   : > { %vm1324_vm0 = vcmp.gt.s32.totalorder %v1323_v33, 0  ;;  %vm1116_vm1 = vcmp.gt.s32.totalorder %v1115_v34, 0  ;;  %v3651_v51 = vadd.s32 4294967169, %v1421_v39 }
 0x27f   : > { %v1325_v38 = vsel %vm1324_vm0, %v1323_v33, 0  ;;  %v1117_v43 = vsel %vm1116_vm1, %v1115_v34, 0  ;;  %v1425_v17 = vor.u32 8388608, %v1424_v44  ;;  %v3643_v39 = vadd.s32 4294967169, %v1213_v45 }
 0x280   : > { %v1327_v40 = vand.u32 31, %v1325_v38  ;;  %v1326_v46 = vshrl.u32 %v1325_v38, 5  ;;  %v5548_v3 = vand.u32 31, %v1117_v43  ;;  %v1427_v9 = vadd.s32 1, %v3651_v51 }
 0x281   : > { %v5563_v33 = vshrl.u32 %v1117_v43, 5  ;;  %v5569_v38 = vshll.u32 %v1425_v17, 8 }
 0x282   : > { %v1328_v42 = vsub.s32 32, %v1327_v40  ;;  %v1330_v48 = vshll.u32 %v4920_v47, %v1327_v40  ;;  %v1333_v50 = vshll.u32 %v4921_v49, %v1327_v40  ;;  %v1336_v55 = vshll.u32 %v4922_v53, %v1327_v40 }
 0x283   : > { %v1339_v58 = vshll.u32 %v4923_v56, %v1327_v40  ;;  %v1342_v61 = vshll.u32 %v4924_v59, %v1327_v40  ;;  %vm1345_vm2 = vcmp.lt.s32.totalorder %v1326_v46, 1  ;;  %vm1348_vm3 = vcmp.lt.s32.totalorder %v1326_v46, 4 }
 0x284   : > { %v1331_v52 = vshrl.u32 %v4921_v49, %v1328_v42  ;;  %v1334_v54 = vshrl.u32 %v4922_v53, %v1328_v42  ;;  %v1337_v57 = vshrl.u32 %v4923_v56, %v1328_v42  ;;  %v1340_v60 = vshrl.u32 %v4924_v59, %v1328_v42 }
 0x285   : > { %v1343_v63 = vshrl.u32 %v4925_v62, %v1328_v42  ;;  %v1329_v10 = vshrl.u32 %v4920_v47, %v1328_v42  ;;  %vm1347_vm4 = vcmp.lt.s32.totalorder %v1326_v46, 3  ;;  %vm1346_vm5 = vcmp.lt.s32.totalorder %v1326_v46, 2 }
 0x286   : > { %v1332_v0 = vor.u32 %v1331_v52, %v1330_v48  ;;  %v1335_v1 = vor.u32 %v1334_v54, %v1333_v50  ;;  %v1338_v2 = vor.u32 %v1337_v57, %v1336_v55  ;;  %v1341_v4 = vor.u32 %v1340_v60, %v1339_v58 }
 0x287   : > { %v1344_v5 = vor.u32 %v1343_v63, %v1342_v61  ;;  %v5561_v28 = vsub.s32 32, %v5548_v3  ;;  %vm1428_vm6 = vcmp.gt.s32.totalorder %v1427_v9, 0  ;;  %v1134_v17 = vshll.u32 %v4924_v59, %v5548_v3 }
 0x288   : > { %v1350_v6 = vsel %vm1348_vm3, %v1338_v2, 2102212464  ;;  %v1353_v7 = vsel %vm1345_vm2, %v1332_v0, %v1335_v1  ;;  %v1357_v8 = vsel %vm1345_vm2, %v1335_v1, %v1338_v2  ;;  %v1354_v11 = vsel %vm1348_vm3, %v1341_v4, 920167782 }
 0x289   : > { %v1358_v12 = vsel %vm1348_vm3, %v1344_v5, 1326507024  ;;  %v1355_v13 = vsel %vm1347_vm4, %v1338_v2, %v1354_v11  ;;  %v1349_v18 = vsel %vm1345_vm2, %v1329_v10, %v1332_v0  ;;  %v1351_v20 = vsel %vm1347_vm4, %v1335_v1, %v1350_v6 }
 0x28a   : > { %v1359_v14 = vsel %vm1347_vm4, %v1341_v4, %v1358_v12  ;;  %v1356_v21 = vsel %vm1346_vm5, %v1353_v7, %v1355_v13  ;;  %v1352_v29 = vsel %vm1346_vm5, %v1349_v18, %v1351_v20  ;;  %v1429_v32 = vsel %vm1428_vm6, %v1427_v9, 0 }
 0x28b   : > { %v1360_v22 = vsel %vm1346_vm5, %v1357_v8, %v1359_v14  ;;  %v5556_v25 = vmul.u32.u64.low %v5534_v41, %v1356_v21  ;;  %v5557_v26 = vmul.u32.u64.high %v5534_v41, %v1356_v21, %v5556_v25  ;;  %v1431_v34 = vand.u32 31, %v1429_v32 }
 0x28c   : > { %v5552_v23 = vmul.u32.u64.low %v5534_v41, %v1360_v22  ;;  %v5553_v24 = vmul.u32.u64.high %v5534_v41, %v1360_v22, %v5552_v23  ;;  %v1368_v40 = vmul.u32 %v5534_v41, %v1352_v29  ;;  %v5574_v42 = vshrl.u32 %v4925_v62, %v5561_v28 }
 0x28d   : > { %v1371_v37 = vadd.s32 1, %v5557_v26  ;;  %v1430_v44 = vshrl.u32 %v1429_v32, 5  ;;  %v1432_v43 = vsub.s32 32, %v1431_v34  ;;  %v1434_v48 = vshll.u32 %v4920_v47, %v1431_v34 }
 0x28e   : > { %vm1370_vm7 = vc.u32 %v5553_v24, %v5556_v25  ;;  %v1437_v50 = vshll.u32 %v4921_v49, %v1431_v34  ;;  %v1440_v51 = vshll.u32 %v4922_v53, %v1431_v34  ;;  %v1443_v41 = vshll.u32 %v4923_v56, %v1431_v34 }
 0x28f   : > { %v1372_v46 = vsel %vm1370_vm7, %v1371_v37, %v5557_v26  ;;  %v1435_v54 = vshrl.u32 %v4921_v49, %v1432_v43  ;;  %v1438_v45 = vshrl.u32 %v4922_v53, %v1432_v43  ;;  %v1441_v55 = vshrl.u32 %v4923_v56, %v1432_v43 }
 0x290   : > { %v1373_v52 = vadd.s32 %v1372_v46, %v1368_v40  ;;  %v1444_v57 = vshrl.u32 %v4924_v59, %v1432_v43  ;;  %v1446_v58 = vshll.u32 %v4924_v59, %v1431_v34  ;;  %v1447_v60 = vshrl.u32 %v4925_v62, %v1432_v43 }
 0x291   : > { %v1436_v63 = vor.u32 %v1435_v54, %v1434_v48  ;;  %v1439_v0 = vor.u32 %v1438_v45, %v1437_v50  ;;  %v1219_v1 = vadd.s32 1, %v3643_v39  ;;  %v1442_v2 = vor.u32 %v1441_v55, %v1440_v51 }
 0x292   : > { %v1374_v61 = vadd.s32 536870912, %v1373_v52  ;;  %v1445_v4 = vor.u32 %v1444_v57, %v1443_v41  ;;  %v1448_v5 = vor.u32 %v1447_v60, %v1446_v58  ;;  %vm1449_vm8 = vcmp.lt.s32.totalorder %v1430_v44, 1 }
 0x293   : > { %vm1451_vm9 = vcmp.lt.s32.totalorder %v1430_v44, 3  ;;  %vm1452_vm10 = vcmp.lt.s32.totalorder %v1430_v44, 4  ;;  %v1457_v7 = vsel %vm1449_vm8, %v1436_v63, %v1439_v0  ;;  %v1461_v10 = vsel %vm1449_vm8, %v1439_v0, %v1442_v2 }
 0x294   : > { %v5587_v6 = vshrl.u32 %v1374_v61, 30  ;;  %v1454_v8 = vsel %vm1452_vm10, %v1442_v2, 2102212464  ;;  %v1458_v9 = vsel %vm1452_vm10, %v1445_v4, 920167782  ;;  %v1433_v13 = vshrl.u32 %v4920_v47, %v1432_v43 }
 0x295   : > { %v1462_v11 = vsel %vm1452_vm10, %v1448_v5, 1326507024  ;;  %vm1450_vm11 = vcmp.lt.s32.totalorder %v1430_v44, 2  ;;  %v1459_v14 = vsel %vm1451_vm9, %v1442_v2, %v1458_v9  ;;  %vm1220_vm12 = vcmp.gt.s32.totalorder %v1219_v1, 0 }
 0x296   : > { %v1376_v12 = vshll.u32 %v5587_v6, 30  ;;  %v1460_v18 = vsel %vm1450_vm11, %v1457_v7, %v1459_v14  ;;  %v1463_v20 = vsel %vm1451_vm9, %v1445_v4, %v1462_v11  ;;  %v1132_v21 = vshrl.u32 %v4924_v59, %v5561_v28 }
 0x297   : > { %v1453_v22 = vsel %vm1449_vm8, %v1433_v13, %v1436_v63  ;;  %v1455_v23 = vsel %vm1451_vm9, %v1439_v0, %v1454_v8  ;;  %v1464_v26 = vsel %vm1450_vm11, %v1461_v10, %v1463_v20  ;;  %v1131_v40 = vshll.u32 %v4923_v56, %v5548_v3 }
 0x298   : > { %v5604_v29 = vmul.u32.u64.low %v5569_v38, %v1464_v26  ;;  %v5605_v32 = vmul.u32.u64.high %v5569_v38, %v1464_v26, %v5604_v29  ;;  %v5608_v34 = vmul.u32.u64.low %v5569_v38, %v1460_v18  ;;  %v5609_v37 = vmul.u32.u64.high %v5569_v38, %v1460_v18, %v5608_v34 }
 0x299   : > { %v5612_v39 = vsub.s32 %v1373_v52, %v1376_v12  ;;  %v1136_v43 = vor.u32 %v5574_v42, %v1134_v17  ;;  %v1221_v46 = vsel %vm1220_vm12, %v1219_v1, 0  ;;  %v1456_v48 = vsel %vm1450_vm11, %v1453_v22, %v1455_v23 }
 0x29a   : > { %v1123_v50 = vshrl.u32 %v4921_v49, %v5561_v28  ;;  %v1126_v51 = vshrl.u32 %v4922_v53, %v5561_v28  ;;  %v1133_v54 = vor.u32 %v1132_v21, %v1131_v40  ;;  %vm1140_vm13 = vcmp.lt.s32.totalorder %v5563_v33, 4 }
 0x29b   : > { %v1112_v52 = vand.u32 8388607, %v1105_v35  ;;  %v1122_v45 = vshll.u32 %v4920_v47, %v5548_v3  ;;  %vm1474_vm14 = vc.u32 %v5605_v32, %v5608_v34  ;;  %v1475_v42 = vadd.s32 1, %v5609_v37 }
 0x29c   : > { %v1223_v44 = vand.u32 31, %v1221_v46  ;;  %v1125_v41 = vshll.u32 %v4921_v49, %v5548_v3  ;;  %v1379_v55 = vsub.s32 0, %v5612_v39  ;;  %v1150_v57 = vsel %vm1140_vm13, %v1136_v43, 1326507024 }
 0x29d   : > { %v1472_v58 = vmul.u32 %v5569_v38, %v1456_v48  ;;  %v1128_v60 = vshll.u32 %v4922_v53, %v5548_v3  ;;  %v1476_v61 = vsel %vm1474_vm14, %v1475_v42, %v5609_v37  ;;  %v1124_v63 = vor.u32 %v1123_v50, %v1122_v45 }
 0x29e   : > { %v1127_v0 = vor.u32 %v1126_v51, %v1125_v41  ;;  %v1129_v1 = vshrl.u32 %v4923_v56, %v5561_v28  ;;  %v1146_v2 = vsel %vm1140_vm13, %v1133_v54, 920167782  ;;  %v1113_v5 = vor.u32 8388608, %v1112_v52 }
 0x29f   : > { %v1477_v4 = vadd.s32 %v1476_v61, %v1472_v58  ;;  %v5643_v7 = vsub.s32 32, %v1223_v44  ;;  %vm1139_vm15 = vcmp.lt.s32.totalorder %v5563_v33, 3  ;;  %v3648_v38 = vmin.u32 %v1379_v55, %v5612_v39 }
 0x2a0   : > { %v1130_v8 = vor.u32 %v1129_v1, %v1128_v60  ;;  %vm1137_vm0 = vcmp.lt.s32.totalorder %v5563_v33, 1  ;;  %v1151_v9 = vsel %vm1139_vm15, %v1133_v54, %v1150_v57  ;;  %v1121_v14 = vshrl.u32 %v4920_v47, %v5561_v28 }
 0x2a1   : > { %v1478_v3 = vadd.s32 536870912, %v1477_v4  ;;  %v1145_v10 = vsel %vm1137_vm0, %v1124_v63, %v1127_v0  ;;  %vm1138_vm1 = vcmp.lt.s32.totalorder %v5563_v33, 2  ;;  %v1153_v17 = vshll.u32 %v1113_v5, 8 }
 0x2a2   : > { %v1147_v11 = vsel %vm1139_vm15, %v1130_v8, %v1146_v2  ;;  %v1149_v12 = vsel %vm1137_vm0, %v1127_v0, %v1130_v8  ;;  %v5661_v18 = vshrl.u32 %v1221_v46, 5  ;;  %v1236_v20 = vshrl.u32 %v4924_v59, %v5643_v7 }
 0x2a3   : > { %v5656_v13 = vshrl.u32 %v1478_v3, 30  ;;  %v1142_v21 = vsel %vm1140_vm13, %v1130_v8, 2102212464  ;;  %v1152_v22 = vsel %vm1138_vm1, %v1149_v12, %v1151_v9  ;;  %v1381_v23 = vclz %v3648_v38 }
 0x2a4   : > { %v1239_v28 = vshrl.u32 %v4925_v62, %v5643_v7  ;;  %v1148_v29 = vsel %vm1138_vm1, %v1145_v10, %v1147_v11  ;;  %v1235_v37 = vshll.u32 %v4923_v56, %v1223_v44  ;;  %v1209_v46 = vand.u32 2147483647, %v5526_v30 }
 0x2a5   : > { %v1480_v26 = vshll.u32 %v5656_v13, 30  ;;  %v5675_v40 = vmul.u32.u64.low %v1153_v17, %v1152_v22  ;;  %v5676_v43 = vmul.u32.u64.high %v1153_v17, %v1152_v22, %v5675_v40  ;;  %v1238_v50 = vshll.u32 %v4924_v59, %v1223_v44 }
 0x2a6   : > { %v1141_v51 = vsel %vm1137_vm0, %v1121_v14, %v1124_v63  ;;  %v1143_v62 = vsel %vm1139_vm15, %v1127_v0, %v1142_v21  ;;  %vm1244_vm2 = vcmp.lt.s32.totalorder %v5661_v18, 4  ;;  %v3649_v45 = vadd.s32 4294967294, %v1381_v23 }
 0x2a7   : > { %v5679_v48 = vsub.s32 %v1477_v4, %v1480_v26  ;;  %v5687_v54 = vmul.u32.u64.low %v1153_v17, %v1148_v29  ;;  %v5688_v52 = vmul.u32.u64.high %v1153_v17, %v1148_v29, %v5687_v54  ;;  %v1237_v41 = vor.u32 %v1236_v20, %v1235_v37 }
 0x2a8   : > { %v1240_v55 = vor.u32 %v1239_v28, %v1238_v50  ;;  %v1144_v59 = vsel %vm1138_vm1, %v1141_v51, %v1143_v62  ;;  %v1216_v57 = vand.u32 8388607, %v1209_v46  ;;  %v1226_v58 = vshll.u32 %v4920_v47, %v1223_v44 }
 0x2a9   : > { %v1483_v42 = vsub.s32 0, %v5679_v48  ;;  %v1227_v60 = vshrl.u32 %v4921_v49, %v5643_v7  ;;  %vm1162_vm3 = vc.u32 %v5676_v43, %v5687_v54  ;;  %v1229_v63 = vshll.u32 %v4921_v49, %v1223_v44 }
 0x2aa   : > { %v1230_v0 = vshrl.u32 %v4922_v53, %v5643_v7  ;;  %v1163_v33 = vadd.s32 1, %v5688_v52  ;;  %v1232_v2 = vshll.u32 %v4922_v53, %v1223_v44  ;;  %v1233_v4 = vshrl.u32 %v4923_v56, %v5643_v7 }
 0x2ab   : > { %v3652_v61 = vmin.u32 %v1483_v42, %v5679_v48  ;;  %v1228_v1 = vor.u32 %v1227_v60, %v1226_v58  ;;  %v1250_v8 = vsel %vm1244_vm2, %v1237_v41, 920167782  ;;  %v1160_v38 = vmul.u32 %v1153_v17, %v1144_v59 }
 0x2ac   : > { %v1231_v3 = vor.u32 %v1230_v0, %v1229_v63  ;;  %vm3650_vm4 = vcmp.lt.s32.totalorder %v3649_v45, 0  ;;  %v1254_v49 = vsel %vm1244_vm2, %v1240_v55, 1326507024  ;;  %v1164_v9 = vsel %vm1162_vm3, %v1163_v33, %v5688_v52 }
 0x2ad   : > { %v1485_v5 = vclz %v3652_v61  ;;  %v1234_v10 = vor.u32 %v1233_v4, %v1232_v2  ;;  %v1165_v12 = vadd.s32 %v1164_v9, %v1160_v38  ;;  %vm1241_vm5 = vcmp.lt.s32.totalorder %v5661_v18, 1 }
 0x2ae   : > { %vm1243_vm6 = vcmp.lt.s32.totalorder %v5661_v18, 3  ;;  %v1217_v53 = vor.u32 8388608, %v1216_v57  ;;  %v1249_v56 = vsel %vm1241_vm5, %v1228_v1, %v1231_v3  ;;  %v1384_v21 = vsel %vm3650_vm4, 0, %v3649_v45 }
 0x2af   : > { %v3653_v11 = vadd.s32 4294967294, %v1485_v5  ;;  %v1251_v44 = vsel %vm1243_vm6, %v1234_v10, %v1250_v8  ;;  %v1166_v14 = vadd.s32 536870912, %v1165_v12  ;;  %v1253_v17 = vsel %vm1241_vm5, %v1231_v3, %v1234_v10 }
 0x2b0   : > { %v1255_v20 = vsel %vm1243_vm6, %v1237_v41, %v1254_v49  ;;  %vm1242_vm8 = vcmp.lt.s32.totalorder %v5661_v18, 2  ;;  %v1246_v23 = vsel %vm1244_vm2, %v1234_v10, 2102212464  ;;  %v1257_v37 = vshll.u32 %v1217_v53, 8 }
 0x2b1   : > { %vm3654_vm7 = vcmp.lt.s32.totalorder %v3653_v11, 0  ;;  %v5727_v26 = vshrl.u32 %v1166_v14, 30  ;;  %v1252_v28 = vsel %vm1242_vm8, %v1249_v56, %v1251_v44  ;;  %v1256_v29 = vsel %vm1242_vm8, %v1253_v17, %v1255_v20 }
 0x2b2   : > { %v1488_v22 = vsel %vm3654_vm7, 0, %v3653_v11  ;;  %v1389_v40 = vsub.s32 4294967266, %v1384_v21  ;;  %v1225_v51 = vshrl.u32 %v4920_v47, %v5643_v7  ;;  %v1247_v41 = vsel %vm1243_vm6, %v1231_v3, %v1246_v23 }
 0x2b3   : > { %v1493_v50 = vsub.s32 4294967266, %v1488_v22  ;;  %v1168_v62 = vshll.u32 %v5727_v26, 30  ;;  %v5736_v52 = vmul.u32.u64.low %v1257_v37, %v1256_v29  ;;  %v5737_v45 = vmul.u32.u64.high %v1257_v37, %v1256_v29, %v5736_v52 }
 0x2b4   : > { %v1245_v42 = vsel %vm1241_vm5, %v1225_v51, %v1228_v1  ;;  %v5743_v55 = vmul.u32.u64.low %v1257_v37, %v1252_v28  ;;  %v5744_v59 = vmul.u32.u64.high %v1257_v37, %v1252_v28, %v5743_v55  ;;  %v1390_v58 = vadd.s32 127, %v1389_v40 }
 0x2b5   : > { %v1169_v57 = vsub.s32 %v1165_v12, %v1168_v62  ;;  %v1494_v60 = vadd.s32 127, %v1493_v50  ;;  %v1248_v47 = vsel %vm1242_vm8, %v1245_v42, %v1247_v41  ;;  %v1385_v7 = vsub.s32 32, %v1384_v21 }
 0x2b6   : > { %vm1266_vm9 = vc.u32 %v5737_v45, %v5743_v55  ;;  %v1489_v63 = vsub.s32 32, %v1488_v22  ;;  %v1267_v0 = vadd.s32 1, %v5744_v59  ;;  %v1369_v33 = vadd.s32 %v5556_v25, %v5553_v24 }
 0x2b7   : > { %v1171_v61 = vsub.s32 0, %v1169_v57  ;;  %v1473_v1 = vadd.s32 %v5608_v34, %v5605_v32  ;;  %v1391_v4 = vshll.u32 %v1390_v58, 23  ;;  %v1495_v5 = vshll.u32 %v1494_v60, 23 }
 0x2b8   : > { %v1264_v8 = vmul.u32 %v1257_v37, %v1248_v47  ;;  %v1268_v18 = vsel %vm1266_vm9, %v1267_v0, %v5744_v59  ;;  %v1387_v3 = vshrl.u32 %v1369_v33, %v1385_v7  ;;  %v1386_v10 = vshll.u32 %v5612_v39, %v1384_v21 }
 0x2b9   : > { %v3640_v2 = vmin.u32 %v1171_v61, %v1169_v57  ;;  %v1491_v49 = vshrl.u32 %v1473_v1, %v1489_v63  ;;  %v1392_v12 = vor.u32 4788187, %v1391_v4  ;;  %v1490_v53 = vshll.u32 %v5679_v48, %v1488_v22 }
 0x2ba   : > { %v1269_v9 = vadd.s32 %v1268_v18, %v1264_v8  ;;  %v1496_v24 = vor.u32 4788187, %v1495_v5  ;;  %v1388_v32 = vor.u32 %v1387_v3, %v1386_v10  ;;  %v1161_v14 = vadd.s32 %v5687_v54, %v5676_v43 }
 0x2bb   : > { %v1173_v38 = vclz %v3640_v2  ;;  %v1492_v34 = vor.u32 %v1491_v49, %v1490_v53  ;;  %v1393_v23 = vand.u32 2147483647, %v1392_v12  ;;  %vm1315_vm11 = vcmp.lt.s32.totalorder %v5515_v15, 0 }
 0x2bc   : > { %v1270_v25 = vadd.s32 536870912, %v1269_v9  ;;  %v1497_v28 = vand.u32 2147483647, %v1496_v24  ;;  %v1395_v22 = vcvt.s32.f32 %v1388_v32  ;;  %vm1419_vm12 = vcmp.lt.s32.totalorder %v5524_v27, 0 }
 0x2bd   : > { %v3641_v11 = vadd.s32 4294967294, %v1173_v38  ;;  %v1499_v37 = vcvt.s32.f32 %v1492_v34  ;;  %vm5772_vm14 = vcmp.le.f32.partialorder %v1313_v19, 0.7853982  ;;  %vm5778_vm15 = vcmp.le.f32.partialorder %v1417_v36, 0.7853982 }
 0x2be   : > { %v5759_v44 = vshrl.u32 %v1270_v25, 30  ;;  %v1396_v62 = vmul.f32 %v1395_v22, %v1393_v23  ;;  %v1265_v4 = vadd.s32 %v5743_v55, %v5737_v45  ;;  %vm1107_vm0 = vcmp.lt.s32.totalorder %v5517_v16, 0 }
 0x2bf   : > { %vm3642_vm10 = vcmp.lt.s32.totalorder %v3641_v11, 0  ;;  %v1500_v52 = vmul.f32 %v1499_v37, %v1497_v28  ;;  %vm5794_vm1 = vcmp.le.f32.partialorder %v1105_v35, 0.7853982  ;;  %v1503_v24 = vsub.s32 4, %v5656_v13 }
 0x2c0   : > { %v1176_v56 = vsel %vm3642_vm10, 0, %v3641_v11  ;;  %v1272_v39 = vshll.u32 %v5759_v44, 30  ;;  %v1397_v58 = vxor.u32 2147483648, %v1396_v62  ;;  %v1295_v32 = vsub.s32 4, %v5759_v44 }
 0x2c1   : > { %v1177_v17 = vsub.s32 32, %v1176_v56  ;;  %v1181_v20 = vsub.s32 4294967266, %v1176_v56  ;;  %v1178_v21 = vshll.u32 %v1169_v57, %v1176_v56  ;;  %v1501_v60 = vxor.u32 2147483648, %v1500_v52 }
 0x2c2   : > { %v1273_v40 = vsub.s32 %v1269_v9, %v1272_v39  ;;  %v1398_v57 = vsel %vm1315_vm11, %v1397_v58, %v1396_v62  ;;  %v1191_v9 = vsub.s32 4, %v5727_v26  ;;  %v1399_v34 = vsub.s32 4, %v5587_v6 }
 0x2c3   : > { %v1179_v29 = vshrl.u32 %v1161_v14, %v1177_v17  ;;  %v1182_v48 = vadd.s32 127, %v1181_v20  ;;  %v1502_v63 = vsel %vm1419_vm12, %v1501_v60, %v1500_v52  ;;  %v1401_v18 = vsel %vm5772_vm14, %v5515_v15, %v1398_v57 }
 0x2c4   : > { %v1275_v42 = vsub.s32 0, %v1273_v40  ;;  %v1505_v19 = vsel %vm5778_vm15, %v5524_v27, %v1502_v63  ;;  %4289 = vcosq.f32 %v1401_v18  ;;  %v1192_v53 = vsel %vm1107_vm0, %v1191_v9, %v5727_v26 }
 0x2c5   : > { %v1180_v50 = vor.u32 %v1179_v29, %v1178_v21  ;;  %v1183_v51 = vshll.u32 %v1182_v48, 23  ;;  %4291 = vcosq.f32 %v1505_v19  ;;  %v1194_v56 = vsel %vm5794_vm1, 0, %v1192_v53 }
 0x2c6   : > { %v3644_v59 = vmin.u32 %v1275_v42, %v1273_v40  ;;  %4293 = vsinq.f32 %v1505_v19  ;;  %v1504_v17 = vsel %vm1419_vm12, %v1503_v24, %v5656_v13  ;;  %vm1211_vm2 = vcmp.lt.s32.totalorder %v5526_v30, 0 }
 0x2c7   : > { %v1184_v41 = vor.u32 4788187, %v1183_v51  ;;  %v1187_v54 = vcvt.s32.f32 %v1180_v50  ;;  %4295 = vsinq.f32 %v1401_v18  ;;  %v1198_v20 = vadd.s32 3, %v1194_v56 }
 0x2c8   : > { %v1277_v61 = vclz %v3644_v59  ;;  %v1296_v23 = vsel %vm1211_vm2, %v1295_v32, %v5759_v44  ;;  %v1400_v39 = vsel %vm1315_vm11, %v1399_v34, %v5587_v6  ;;  %vm1210_vm3 = vcmp.le.f32.partialorder %v1209_v46, 0.7853982 }
 0x2c9   : > { %v1185_v43 = vand.u32 2147483647, %v1184_v41  ;;  %v1506_v48 = vsel %vm5778_vm15, 0, %v1504_v17  ;;  %v1298_v44 = vsel %vm1210_vm3, 0, %v1296_v23  ;;  %v1616_v37 = vand.u32 3, %v1194_v56 }
 0x2ca   : > { %v3645_v7 = vadd.s32 4294967294, %v1277_v61  ;;  %v1199_v50 = vand.u32 3, %v1198_v20  ;;  %v5830_v6 = vsel %vm5772_vm14, 0, %v1400_v39  ;;  %v1925_v51 = vand.u32 3, %v1506_v48  ;;  %v4242_v20 = vld [vmem:[#allocation5 + $0x8] sm:$0xff]  }
 0x2cb   : > { %v1188_v47 = vmul.f32 %v1187_v54, %v1185_v43  ;;  %v1302_v52 = vadd.s32 3, %v1298_v44  ;;  %vm1617_vm4 = vcmp.lt.s32.totalorder %v1616_v37, 2  ;;  %vm1618_vm5 = vcmp.eq.s32.totalorder %v1616_v37, 0 }
 0x2cc   : > { %vm3646_vm13 = vcmp.lt.s32.totalorder %v3645_v7, 0  ;;  %vm1509_vm6 = vweird.f32 %v5524_v27  ;;  %v1822_v59 = vand.u32 3, %v5830_v6  ;;  %vm1201_vm7 = vcmp.eq.s32.totalorder %v1199_v50, 0  ;;  %v4249_v27 = vld [vmem:[#allocation13] sm:$0xff]  }
 0x2cd   : > { %v1189_v0 = vxor.u32 2147483648, %v1188_v47  ;;  %v1280_v1 = vsel %vm3646_vm13, 0, %v3645_v7  ;;  %v1719_v43 = vand.u32 3, %v1298_v44  ;;  %vm1200_vm8 = vcmp.lt.s32.totalorder %v1199_v50, 2 }
 0x2ce   : > { %v1281_v5 = vsub.s32 32, %v1280_v1  ;;  %v1285_v8 = vsub.s32 4294967266, %v1280_v1  ;;  %v1282_v36 = vshll.u32 %v1273_v40, %v1280_v1  ;;  %v5812_v28 = vpop.eup %4289  ;;  %vm1405_vm9 = vweird.f32 %v5515_v15  ;;  %v3687_v15 = vld [vmem:[#allocation8] ss:$0 sm:$0xff] }
 0x2cf   : > { %v1190_v38 = vsel %vm1107_vm0, %v1189_v0, %v1188_v47  ;;  %v5819_v29 = vpop.eup %4291  ;;  %v1413_v58 = vxor.u32 2147483648, %v5812_v28  ;;  %vm1927_vm10 = vcmp.eq.s32.totalorder %v1925_v51, 0  ;;  %vm1930_vm11 = vcmp.eq.s32.totalorder %v1925_v51, 2 }
 0x2d0   : > { %v1283_v3 = vshrl.u32 %v1265_v4, %v1281_v5  ;;  %v1286_v49 = vadd.s32 127, %v1285_v8  ;;  %v1193_v11 = vsel %vm5794_vm1, %v5517_v16, %v1190_v38  ;;  %v5824_v22 = vpop.eup %4293  ;;  %v1517_v41 = vxor.u32 2147483648, %v5819_v29 }
 0x2d1   : > { %4297 = vcosq.f32 %v1193_v11  ;;  %v5826_v40 = vpop.eup %4295  ;;  %v1514_v42 = vxor.u32 2147483648, %v5824_v22  ;;  %vm1204_vm13 = vcmp.eq.s32.totalorder %v1199_v50, 2  ;;  %v1303_v47 = vand.u32 3, %v1302_v52 }
 0x2d2   : > { %v1284_v55 = vor.u32 %v1283_v3, %v1282_v36  ;;  %v1287_v10 = vshll.u32 %v1286_v49, 23  ;;  %4299 = vsinq.f32 %v1193_v11  ;;  %v1410_v54 = vxor.u32 2147483648, %v5826_v40 }
 0x2d3   : > { %v1929_v7 = vsel %vm1927_vm10, %v5819_v29, %v1514_v42  ;;  %v1932_v57 = vsel %vm1930_vm11, %v1517_v41, %v5824_v22  ;;  %vm1621_vm15 = vcmp.eq.s32.totalorder %v1616_v37, 2  ;;  %v1510_v63 = vadd.s32 3, %v1506_v48 }
 0x2d4   : > { %v1288_v12 = vor.u32 4788187, %v1287_v10  ;;  %v1291_v35 = vcvt.s32.f32 %v1284_v55  ;;  %vm1824_vm1 = vcmp.eq.s32.totalorder %v1822_v59, 0  ;;  %vm1926_vm12 = vcmp.lt.s32.totalorder %v1925_v51, 2  ;;  %v4248_v51 = vld [vmem:[#allocation10 + $0x18] sm:$0xff]  }
 0x2d5   : > { %v1826_v0 = vsel %vm1824_vm1, %v5812_v28, %v1410_v54  ;;  %vm1721_vm10 = vcmp.eq.s32.totalorder %v1719_v43, 0  ;;  %v1933_v5 = vsel %vm1926_vm12, %v1929_v7, %v1932_v57  ;;  %vm1305_vm11 = vcmp.eq.s32.totalorder %v1303_v47, 0 }
 0x2d6   : > { %v1289_v25 = vand.u32 2147483647, %v1288_v12  ;;  %vm1308_vm0 = vcmp.eq.s32.totalorder %v1303_v47, 2  ;;  %vm1724_vm14 = vcmp.eq.s32.totalorder %v1719_v43, 2  ;;  %v1934_v55 = vsel %vm1509_vm6, nan, %v1933_v5 }
 0x2d7   : > { %vm1720_vm12 = vcmp.lt.s32.totalorder %v1719_v43, 2  ;;  %v1511_v39 = vand.u32 3, %v1510_v63 }
 0x2d8   : > { %v1292_v14 = vmul.f32 %v1291_v35, %v1289_v25 }
 0x2d9   : > { %vm1513_vm1 = vcmp.eq.s32.totalorder %v1511_v39, 0 }
 0x2da   : > { %v1293_v26 = vxor.u32 2147483648, %v1292_v14 }
 0x2db   : > { %v4298_v46 = vpop.eup %4297 }
 0x2dc   : > { %v1294_v21 = vsel %vm1211_vm2, %v1293_v26, %v1292_v14  ;;  %v4300_v62 = vpop.eup %4299  ;;  %v1205_v61 = vxor.u32 2147483648, %v4298_v46  ;;  %vm1827_vm2 = vcmp.eq.s32.totalorder %v1822_v59, 2  ;;  %v1406_v26 = vadd.s32 3, %v5830_v6 }
 0x2dd   : > { %v1297_v13 = vsel %vm1210_vm3, %v5526_v30, %v1294_v21  ;;  %v1202_v60 = vxor.u32 2147483648, %v4300_v62  ;;  %vm1823_vm3 = vcmp.lt.s32.totalorder %v1822_v59, 2  ;;  %v1829_v33 = vsel %vm1827_vm2, %v1413_v58, %v5826_v40 }
 0x2de   : > { %4301 = vcosq.f32 %v1297_v13  ;;  %v1623_v4 = vsel %vm1621_vm15, %v1205_v61, %v4300_v62  ;;  %v1206_v38 = vsel %vm1204_vm13, %v1205_v61, %v4300_v62  ;;  %v1830_v3 = vsel %vm1823_vm3, %v1826_v0, %v1829_v33 }
 0x2df   : > { %4303 = vsinq.f32 %v1297_v13  ;;  %v1620_v2 = vsel %vm1618_vm5, %v4298_v46, %v1202_v60  ;;  %v1203_v19 = vsel %vm1201_vm7, %v4298_v46, %v1202_v60  ;;  %vm1304_vm5 = vcmp.lt.s32.totalorder %v1303_v47, 2  ;;  %v4247_v46 = vld [vmem:[#allocation10 + $0x10] sm:$0xff]  }
 0x2e0   : > { %v1624_v9 = vsel %vm1617_vm4, %v1620_v2, %v1623_v4  ;;  %v1207_v12 = vsel %vm1200_vm8, %v1203_v19, %v1206_v38  ;;  %v1831_v25 = vsel %vm1405_vm9, nan, %v1830_v3  ;;  %vm6198_vm7 = vweird.f32 %v5526_v30 }
 0x2e1   : > { %vm6199_vm4 = vweird.f32 %v5517_v16  ;;  %vm6200_vm13 = vmmov %vm6198_vm7  ;;  %v5870_v56 = vpack.c.bf16 %v1934_v55, %v1831_v25  ;;  %v1407_v30 = vand.u32 3, %v1406_v26  ;;  %v4243_v16 = vld [vmem:[#allocation5 + $0x10] sm:$0xff]   ;;  %vm1516_vm2 = vcmp.eq.s32.totalorder %v1511_v39, 2 }
 0x2e2   : > { %v1625_v32 = vsel %vm6199_vm4, nan, %v1624_v9  ;;  %vm6201_vm8 = vmmov %vm6199_vm4  ;;  %v1515_v21 = vsel %vm1513_vm1, %v5819_v29, %v1514_v42  ;;  %v1518_v13 = vsel %vm1516_vm2, %v1517_v41, %v5824_v22 }
 0x2e3   : > { %v1208_v17 = vsel %vm6201_vm8, nan, %v1207_v12  ;;  %vm1409_vm3 = vcmp.eq.s32.totalorder %v1407_v30, 0 }
 0x2e4   : > { %v1411_v48 = vsel %vm1409_vm3, %v5812_v28, %v1410_v54  ;;  %v4245_v28 = vld [vmem:[#allocation10] sm:$0xff]  }
 0x2e5   : > { %3868 = vmatprep.subr.bf16.mxu1 %v4245_v28 }
 0x2e6   : > { %3869 = vmatpush3.bf16.msra.mxu1 %v4245_v28 }
 0x2e8   : > { %v4302_v1 = vpop.eup %4301 }
 0x2e9   : > { %v4304_v8 = vpop.eup %4303  ;;  %v1309_v18 = vxor.u32 2147483648, %v4302_v1 }
 0x2ea   : > { %v1306_v36 = vxor.u32 2147483648, %v4304_v8 }
 0x2eb   : > { %v1310_v49 = vsel %vm1308_vm0, %v1309_v18, %v4304_v8  ;;  %v1726_v45 = vsel %vm1724_vm14, %v1309_v18, %v4304_v8  ;;  %vm6202_vm14 = vcmask 523264  }
 0x2ec   : > { %v1307_v10 = vsel %vm1305_vm11, %v4302_v1, %v1306_v36  ;;  %v1723_v11 = vsel %vm1721_vm10, %v4302_v1, %v1306_v36  ;;  %vm6203_vm15 = vmmov %vm6202_vm14  ;;  %vm1412_vm10 = vcmp.eq.s32.totalorder %v1407_v30, 2  ;;  %vm1512_vm11 = vcmp.lt.s32.totalorder %v1511_v39, 2 }
 0x2ed   : > { %v1311_v53 = vsel %vm1304_vm5, %v1307_v10, %v1310_v49  ;;  %v1727_v24 = vsel %vm1720_vm12, %v1723_v11, %v1726_v45  ;;  %vm6204_vm0 = vmmov %vm6202_vm14  ;;  %v1414_v44 = vsel %vm1412_vm10, %v1413_v58, %v5826_v40  ;;  %v1519_v37 = vsel %vm1512_vm11, %v1515_v21, %v1518_v13  ;;  %v4246_v40 = vld [vmem:[#allocation10 + $0x8] sm:$0xff]  }
 0x2ee   : > { %v1312_v35 = vsel %vm6198_vm7, nan, %v1311_v53  ;;  %v1728_v34 = vsel %vm6200_vm13, nan, %v1727_v24  ;;  %vm1408_vm5 = vcmp.lt.s32.totalorder %v1407_v30, 2  ;;  %v1520_v29 = vsel %vm1509_vm6, nan, %v1519_v37  ;;  %vm6205_vm12 = vmmov %vm6204_vm0  ;;  %3870 = vmatprep.subr.bf16.mxu1 %v4246_v40  ;;  %v4250_v13 = vld [vmem:[#allocation13 + $0x8] sm:$0xff]  }
 0x2ef   : > { %v5872_v14 = vpack.c.bf16 %v1728_v34, %v1625_v32  ;;  %v5877_v23 = vpack.c.bf16 %v1312_v35, %v1208_v17  ;;  %v1415_v50 = vsel %vm1408_vm5, %v1411_v48, %v1414_v44  ;;  %3871 = vmatpush3.bf16.msra.mxu1 %v4246_v40  ;;  %vm6206_vm6 = vmmov %vm6204_vm0  ;;  %v4252_v48 = vld [vmem:[#allocation13 + $0x18] sm:$0xff]   ;;  %v4254_v37 = vld [vmem:[%s6209_s30 + $0x8] sm:$0xff]  }
 0x2f0   : > { %v1416_v22 = vsel %vm1405_vm9, nan, %v1415_v50  ;;  %3872 = vmatprep.subr.bf16.mxu1 %v4247_v46  ;;  %vm6207_vm9 = vmmov %vm6204_vm0  ;;  %v4253_v44 = vld [vmem:[%s6209_s30] sm:$0xff]   ;;  %v4256_v50 = vld [vmem:[%s6209_s30 + $0x18] sm:$0xff]  }
 0x2f1   : > { %3852 = vmatprep.mubr.msk.bf16.mxu0 %vm6202_vm14, %v5872_v14  ;;  %v5902_v6 = vpack.c.bf16 %v1520_v29, %v1416_v22  ;;  %vm6208_vm7 = vmmov %vm6204_vm0  ;;  %v4258_v29 = vld [vmem:[#allocation16 + $0x8] sm:$0xff]   ;;  %v4260_v22 = vld [vmem:[#allocation16 + $0x18] sm:$0xff]  }
 0x2f2   : > { %3853 = vmatmul.mubr.msk.bf16.vlgmr.msra.gmra.mrb[0].mxu0 %vm6203_vm15, %v5870_v56  ;;  %vm6210_vm4 = vmmov %vm6204_vm0  ;;  %v3688_v40 = vld [vmem:[#allocation11] ss:$0 sm:$0xff] }
 0x2f3   : > { %3857 = vmatpush3.bf16.msra.mxu0 %v5528_v31  ;;  %3864 = vmatprep.mubr.msk.bf16.mxu0 %vm6204_vm0, %v5877_v23  ;;  %v4244_v31 = vld [vmem:[#allocation5 + $0x18] sm:$0xff]   ;;  %vm6211_vm13 = vmmov %vm6204_vm0 }
 0x2f4   : > { %3858 = vmatprep.subr.bf16.mxu0 %v4242_v20  ;;  %3873 = vmatpush3.bf16.msra.mxu1 %v4247_v46  ;;  %vm6212_vm8 = vmmov %vm6204_vm0 }
 0x2f5   : > { %3874 = vmatprep.subr.bf16.mxu1 %v4248_v51  ;;  %vm6213_vm14 = vmmov %vm6204_vm0 }
 0x2f6   : > { %vm6214_vm15 = vmmov %vm6204_vm0 }
 0x2f7   : > { %3859 = vmatpush3.bf16.msra.mxu0 %v4242_v20  ;;  %vm6215_vm1 = vmmov %vm6204_vm0 }
 0x2f8   : > { %3860 = vmatprep.subr.bf16.mxu0 %v4243_v16  ;;  %3875 = vmatpush3.bf16.msra.mxu1 %v4248_v51  ;;  %vm6216_vm2 = vmmov %vm6204_vm0 }
 0x2f9   : > { %3880 = vmatprep.subr.bf16.mxu1 %v4249_v27  ;;  %vm6218_vm3 = vmmov %vm6204_vm0 }
 0x2fa   : > { %vm6219_vm10 = vmmov %vm6204_vm0 }
 0x2fb   : > { %3861 = vmatpush3.bf16.msra.mxu0 %v4243_v16  ;;  %vm6220_vm11 = vmmov %vm6204_vm0 }
 0x2fc   : > { %3862 = vmatprep.subr.bf16.mxu0 %v4244_v31  ;;  %vm6222_vm5 = vmmov %vm6204_vm0 }
 0x2ff   : > { %3863 = vmatpush3.bf16.msra.mxu0 %v4244_v31  ;;  %v4251_v31 = vld [vmem:[#allocation13 + $0x10] sm:$0xff]  }
 0x302   : > { %3865 = vmatmul.mubr.msk.bf16.vlgmr.msra.gmra.mrb[0].mxu0 %vm6205_vm12, %v5902_v6  ;;  %vm6223_vm12 = vmmov %vm6204_vm0 }
 0x3d5   : > { %v3866_v62 = vpop.f32.mrb[0].mxu0 }
 0x3d6   : > { %v2137_v52 = vadd.f32 %v3866_v62, %v3687_v15  ;;  %v2113_v42 = vpop.f32.mrb[1].mxu0 }
 0x3d7   : > { %v2135_v41 = vadd.f32 %v3687_v15, %v2113_v42  ;;  %v3867_v59 = vpop.f32.mrb[2].mxu0 }
 0x3d8   : > { %v2141_v43 = vmul.f32 %v2137_v52, %v2137_v52  ;;  %v2138_v54 = vadd.f32 %v3867_v59, %v3687_v15  ;;  %v2116_v58 = vpop.f32.mrb[3].mxu0  ;;  %v3707_v59 = vld [vmem:[#allocation14] ss:$0 sm:$0xff] }
 0x3d9   : > { %v2139_v60 = vmul.f32 %v2135_v41, %v2135_v41  ;;  %v2136_v61 = vadd.f32 %v3687_v15, %v2116_v58 }
 0x3da   : > { %v2145_v47 = vmul.f32 %v2141_v43, %v2137_v52  ;;  %v2142_v7 = vmul.f32 %v2138_v54, %v2138_v54 }
 0x3db   : > { %v2143_v57 = vmul.f32 %v2139_v60, %v2135_v41  ;;  %v2140_v63 = vmul.f32 %v2136_v61, %v2136_v61 }
 0x3dc   : > { %v2149_v0 = vmul.f32 0.044715, %v2145_v47  ;;  %v2146_v33 = vmul.f32 %v2142_v7, %v2138_v54 }
 0x3dd   : > { %v2147_v1 = vmul.f32 0.044715, %v2143_v57  ;;  %v2144_v2 = vmul.f32 %v2140_v63, %v2136_v61 }
 0x3de   : > { %v2153_v4 = vadd.f32 %v2149_v0, %v2137_v52  ;;  %v2150_v5 = vmul.f32 0.044715, %v2146_v33 }
 0x3df   : > { %v2151_v8 = vadd.f32 %v2147_v1, %v2135_v41  ;;  %v2148_v18 = vmul.f32 0.044715, %v2144_v2 }
 0x3e0   : > { %v2157_v19 = vmul.f32 0.7978846, %v2153_v4  ;;  %v2154_v38 = vadd.f32 %v2150_v5, %v2138_v54 }
 0x3e1   : > { %v2155_v36 = vmul.f32 0.7978846, %v2151_v8  ;;  %v2152_v3 = vadd.f32 %v2148_v18, %v2136_v61 }
 0x3e2   : > { %4305 = vtanh.f32 %v2157_v19  ;;  %v2158_v49 = vmul.f32 0.7978846, %v2154_v38 }
 0x3e3   : > { %v2156_v9 = vmul.f32 0.7978846, %v2152_v3  ;;  %4307 = vtanh.f32 %v2155_v36 }
 0x3e4   : > { %4309 = vtanh.f32 %v2158_v49 }
 0x3e5   : > { %4311 = vtanh.f32 %v2156_v9 }
 0x3ec   : > { %v4306_v45 = vpop.eup %4305 }
 0x3ed   : > { %v4308_v55 = vpop.eup %4307  ;;  %v2165_v10 = vadd.f32 1.0, %v4306_v45 }
 0x3ee   : > { %v4310_v11 = vpop.eup %4309  ;;  %v2163_v12 = vadd.f32 1.0, %v4308_v55 }
 0x3ef   : > { %v4312_v53 = vpop.eup %4311  ;;  %v2169_v24 = vmul.f32 0.5, %v2165_v10  ;;  %v2166_v25 = vadd.f32 1.0, %v4310_v11 }
 0x3f0   : > { %v2164_v35 = vadd.f32 1.0, %v4312_v53  ;;  %v2167_v32 = vmul.f32 0.5, %v2163_v12 }
 0x3f1   : > { %v2170_v34 = vmul.f32 0.5, %v2166_v25  ;;  %v2173_v26 = vmul.f32 %v2169_v24, %v2137_v52 }
 0x3f2   : > { %v2168_v17 = vmul.f32 0.5, %v2164_v35  ;;  %v2171_v39 = vmul.f32 %v2167_v32, %v2135_v41 }
 0x3f3   : > { %v2174_v20 = vmul.f32 %v2170_v34, %v2138_v54 }
 0x3f4   : > { %v2172_v30 = vmul.f32 %v2168_v17, %v2136_v61 }
 0x3f5   : > { %v2176_v16 = vpack.c.bf16 %v2174_v20, %v2173_v26 }
 0x3f6   : > { %v2175_v21 = vpack.c.bf16 %v2172_v30, %v2171_v39 }
 0x3f8   : > { %3876 = vmatprep.mubr.msk.bf16.mxu1 %vm6206_vm6, %v2175_v21  ;;  %vm6226_vm6 = vmmov %vm6204_vm0 }
 0x3f9   : > { %3877 = vmatmul.mubr.msk.bf16.vlgmr.msra.gmra.mrb[0].mxu1 %vm6207_vm9, %v2176_v16  ;;  %vm6227_vm9 = vmmov %vm6204_vm0 }
 0x3fa   : > { %3881 = vmatpush3.bf16.msra.mxu1 %v4249_v27  ;;  %3888 = vmatprep.mubr.msk.bf16.mxu1 %vm6208_vm7, %v5872_v14  ;;  %v4255_v14 = vld [vmem:[%s6209_s30 + $0x10] sm:$0xff]  }
 0x3fb   : > { %3882 = vmatprep.subr.bf16.mxu1 %v4250_v13 }
 0x3fe   : > { %3883 = vmatpush3.bf16.msra.mxu1 %v4250_v13 }
 0x3ff   : > { %3884 = vmatprep.subr.bf16.mxu1 %v4251_v31 }
 0x402   : > { %3885 = vmatpush3.bf16.msra.mxu1 %v4251_v31 }
 0x403   : > { %3886 = vmatprep.subr.bf16.mxu1 %v4252_v48 }
 0x406   : > { %3887 = vmatpush3.bf16.msra.mxu1 %v4252_v48 }
 0x407   : > { %3892 = vmatprep.subr.bf16.mxu1 %v4253_v44 }
 0x409   : > { %3889 = vmatmul.mubr.msk.bf16.vlgmr.msra.gmra.mrb[4].mxu1 %vm6210_vm4, %v5870_v56  ;;  %v4257_v56 = vld [vmem:[#allocation16] sm:$0xff]  }
 0x40a   : > { %3893 = vmatpush3.bf16.msra.mxu1 %v4253_v44  ;;  %3900 = vmatprep.mubr.msk.bf16.mxu1 %vm6211_vm13, %v5877_v23  ;;  %v4259_v23 = vld [vmem:[#allocation16 + $0x10] sm:$0xff]  }
 0x40b   : > { %3894 = vmatprep.subr.bf16.mxu1 %v4254_v37  ;;  %3904 = vmatprep.subr.bf16.mxu0 %v4257_v56 }
 0x40c   : > { %3905 = vmatpush3.bf16.msra.mxu0 %v4257_v56  ;;  %v4263_v56 = vld [vmem:[#allocation19 + $0x10] sm:$0xff]  }
 0x40d   : > { %3906 = vmatprep.subr.bf16.mxu0 %v4258_v29 }
 0x40e   : > { %3895 = vmatpush3.bf16.msra.mxu1 %v4254_v37 }
 0x40f   : > { %3896 = vmatprep.subr.bf16.mxu1 %v4255_v14 }
 0x410   : > { %3907 = vmatpush3.bf16.msra.mxu0 %v4258_v29  ;;  %v4264_v29 = vld [vmem:[#allocation19 + $0x18] sm:$0xff]  }
 0x411   : > { %3908 = vmatprep.subr.bf16.mxu0 %v4259_v23 }
 0x412   : > { %3897 = vmatpush3.bf16.msra.mxu1 %v4255_v14  ;;  %v4261_v14 = vld [vmem:[#allocation19] sm:$0xff]  }
 0x413   : > { %3898 = vmatprep.subr.bf16.mxu1 %v4256_v50 }
 0x414   : > { %3909 = vmatpush3.bf16.msra.mxu0 %v4259_v23  ;;  %v4265_v23 = vld [vmem:[#allocation23] sm:$0xff]  }
 0x415   : > { %3910 = vmatprep.subr.bf16.mxu0 %v4260_v22 }
 0x416   : > { %3899 = vmatpush3.bf16.msra.mxu1 %v4256_v50  ;;  %v4262_v50 = vld [vmem:[#allocation19 + $0x8] sm:$0xff]  }
 0x418   : > { %3911 = vmatpush3.bf16.msra.mxu0 %v4260_v22  ;;  %v3708_v22 = vld [vmem:[#allocation17] ss:$0 sm:$0xff] }
 0x419   : > { %3901 = vmatmul.mubr.msk.bf16.vlgmr.msra.gmra.mrb[4].mxu1 %vm6212_vm8, %v5902_v6  ;;  %3916 = vmatprep.subr.bf16.mxu0 %v4261_v14 }
 0x4cc   : > { %v3878_v28 = vpop.f32.mrb[0].mxu1 }
 0x4cd   : > { %v2256_v46 = vpop.f32.mrb[1].mxu1  ;;  %v5928_v27 = vadd.f32 %v3878_v28, %v3688_v40 }
 0x4ce   : > { %v3879_v51 = vpop.f32.mrb[2].mxu1  ;;  %v5932_v62 = vadd.f32 %v3688_v40, %v2256_v46 }
 0x4cf   : > { %v5930_v15 = vadd.f32 %v3879_v51, %v3688_v40  ;;  %v2259_v6 = vpop.f32.mrb[3].mxu1 }
 0x4d0   : > { %v5934_v52 = vadd.f32 %v3688_v40, %v2259_v6 }
 0x4d1   : > { %v2859_v42 = vpack.c.bf16 %v5930_v15, %v5928_v27  ;;  %v4273_v27 = vld [vmem:[%s6093_s19 + $0x20] sm:$0xff]   ;;  %v4274_v15 = vld [vmem:[%s6093_s19 + $0x28] sm:$0xff]  }
 0x4d2   : > { %v2858_v41 = vpack.c.bf16 %v5934_v52, %v5932_v62  ;;  %v4269_v62 = vld [vmem:[%s6093_s19] sm:$0xff]  }
 0x4d3   : > { %v1937_v52 = vld [vmem:[%s5952_s29] sm:$0xff] }
 0x4ec   : > { %v3902_v43 = vpop.f32.mrb[4].mxu1 }
 0x4ed   : > { %v2442_v54 = vadd.f32 %v3902_v43, %v3707_v59  ;;  %v2418_v58 = vpop.f32.mrb[5].mxu1 }
 0x4ee   : > { %v2440_v60 = vadd.f32 %v3707_v59, %v2418_v58  ;;  %v3903_v61 = vpop.f32.mrb[6].mxu1 }
 0x4ef   : > { %v2446_v47 = vmul.f32 %v2442_v54, %v2442_v54  ;;  %v2443_v7 = vadd.f32 %v3903_v61, %v3707_v59  ;;  %v2421_v57 = vpop.f32.mrb[7].mxu1 }
 0x4f0   : > { %v2444_v63 = vmul.f32 %v2440_v60, %v2440_v60  ;;  %v2441_v0 = vadd.f32 %v3707_v59, %v2421_v57 }
 0x4f1   : > { %v2450_v33 = vmul.f32 %v2446_v47, %v2442_v54  ;;  %v2447_v1 = vmul.f32 %v2443_v7, %v2443_v7 }
 0x4f2   : > { %v2448_v2 = vmul.f32 %v2444_v63, %v2440_v60  ;;  %v2445_v4 = vmul.f32 %v2441_v0, %v2441_v0 }
 0x4f3   : > { %v2454_v5 = vmul.f32 0.044715, %v2450_v33  ;;  %v2451_v8 = vmul.f32 %v2447_v1, %v2443_v7 }
 0x4f4   : > { %v2452_v18 = vmul.f32 0.044715, %v2448_v2  ;;  %v2449_v19 = vmul.f32 %v2445_v4, %v2441_v0 }
 0x4f5   : > { %v2458_v38 = vadd.f32 %v2454_v5, %v2442_v54  ;;  %v2455_v36 = vmul.f32 0.044715, %v2451_v8 }
 0x4f6   : > { %v2456_v3 = vadd.f32 %v2452_v18, %v2440_v60  ;;  %v2453_v49 = vmul.f32 0.044715, %v2449_v19 }
 0x4f7   : > { %v2462_v9 = vmul.f32 0.7978846, %v2458_v38  ;;  %v2459_v45 = vadd.f32 %v2455_v36, %v2443_v7 }
 0x4f8   : > { %v2460_v55 = vmul.f32 0.7978846, %v2456_v3  ;;  %v2457_v10 = vadd.f32 %v2453_v49, %v2441_v0 }
 0x4f9   : > { %4313 = vtanh.f32 %v2462_v9  ;;  %v2463_v11 = vmul.f32 0.7978846, %v2459_v45 }
 0x4fa   : > { %4315 = vtanh.f32 %v2460_v55  ;;  %v2461_v12 = vmul.f32 0.7978846, %v2457_v10 }
 0x4fb   : > { %4317 = vtanh.f32 %v2463_v11 }
 0x4fc   : > { %4319 = vtanh.f32 %v2461_v12 }
 0x503   : > { %v4314_v53 = vpop.eup %4313 }
 0x504   : > { %v4316_v24 = vpop.eup %4315  ;;  %v2470_v25 = vadd.f32 1.0, %v4314_v53 }
 0x505   : > { %v4318_v35 = vpop.eup %4317  ;;  %v2468_v32 = vadd.f32 1.0, %v4316_v24 }
 0x506   : > { %v4320_v34 = vpop.eup %4319  ;;  %v2474_v17 = vmul.f32 0.5, %v2470_v25  ;;  %v2471_v26 = vadd.f32 1.0, %v4318_v35 }
 0x507   : > { %v2472_v20 = vmul.f32 0.5, %v2468_v32  ;;  %v2469_v39 = vadd.f32 1.0, %v4320_v34 }
 0x508   : > { %v2475_v30 = vmul.f32 0.5, %v2471_v26  ;;  %v2478_v21 = vmul.f32 %v2474_v17, %v2442_v54 }
 0x509   : > { %v2473_v16 = vmul.f32 0.5, %v2469_v39  ;;  %v2476_v31 = vmul.f32 %v2472_v20, %v2440_v60 }
 0x50a   : > { %v2479_v13 = vmul.f32 %v2475_v30, %v2443_v7 }
 0x50b   : > { %v2477_v48 = vmul.f32 %v2473_v16, %v2441_v0 }
 0x50c   : > { %v2481_v44 = vpack.c.bf16 %v2479_v13, %v2478_v21  ;;  %v4266_v21 = vld [vmem:[#allocation23 + $0x8] sm:$0xff]   ;;  %v4267_v13 = vld [vmem:[#allocation23 + $0x10] sm:$0xff]  }
 0x50d   : > { %v2480_v37 = vpack.c.bf16 %v2477_v48, %v2476_v31  ;;  %v4268_v31 = vld [vmem:[#allocation23 + $0x18] sm:$0xff]  }
 0x50f   : > { %3912 = vmatprep.mubr.msk.bf16.mxu0 %vm6213_vm14, %v2480_v37  ;;  %v4271_v37 = vld [vmem:[%s6093_s19 + $0x10] sm:$0xff]  }
 0x510   : > { %3913 = vmatmul.mubr.msk.bf16.vlgmr.msra.gmra.mrb[4].mxu0 %vm6214_vm15, %v2481_v44  ;;  %v4270_v44 = vld [vmem:[%s6093_s19 + $0x8] sm:$0xff]  }
 0x511   : > { %3917 = vmatpush3.bf16.msra.mxu0 %v4261_v14  ;;  %v4272_v14 = vld [vmem:[%s6093_s19 + $0x18] sm:$0xff]  }
 0x512   : > { %3918 = vmatprep.subr.bf16.mxu0 %v4262_v50 }
 0x515   : > { %3919 = vmatpush3.bf16.msra.mxu0 %v4262_v50  ;;  %v4276_v50 = vld [vmem:[%s6093_s19 + $0x38] sm:$0xff]  }
 0x516   : > { %3920 = vmatprep.subr.bf16.mxu0 %v4263_v56 }
 0x519   : > { %3921 = vmatpush3.bf16.msra.mxu0 %v4263_v56  ;;  %v1939_v56 = vld [vmem:[%s5952_s29 + $0x10] sm:$0xff] }
 0x51a   : > { %3922 = vmatprep.subr.bf16.mxu0 %v4264_v29 }
 0x51d   : > { %3923 = vmatpush3.bf16.msra.mxu0 %v4264_v29  ;;  %v1940_v29 = vld [vmem:[%s5952_s29 + $0x18] sm:$0xff] }
 0x51e   : > { %3940 = vmatprep.subr.bf16.mxu0 %v4265_v23 }
 0x5e3   : > { %v3914_v28 = vpop.f32.mrb[4].mxu0 }
 0x5e4   : > { %v2570_v40 = vadd.f32 %v3914_v28, %v3708_v22  ;;  %v2561_v46 = vpop.f32.mrb[5].mxu0  ;;  %v4278_v28 = vld [vmem:[#allocation22 + $0x8] sm:$0xff]  }
 0x5e5   : > { %v2562_v51 = vadd.f32 %v3708_v22, %v2561_v46  ;;  %v3915_v6 = vpop.f32.mrb[6].mxu0  ;;  %v4280_v46 = vld [vmem:[#allocation22 + $0x18] sm:$0xff]  }
 0x5e6   : > { %v2578_v59 = vmul.f32 %v2570_v40, %v2570_v40  ;;  %v2573_v43 = vadd.f32 %v3915_v6, %v3708_v22  ;;  %v2564_v54 = vpop.f32.mrb[7].mxu0  ;;  %v3715_v6 = vld [vmem:[#allocation20] ss:$0 sm:$0xff] }
 0x5e7   : > { %v2576_v58 = vmul.f32 %v2562_v51, %v2562_v51  ;;  %v2565_v60 = vadd.f32 %v3708_v22, %v2564_v54  ;;  %v4277_v22 = vld [vmem:[#allocation22] sm:$0xff]  }
 0x5e8   : > { %v2582_v61 = vmul.f32 %v2578_v59, %v2570_v40  ;;  %v2579_v47 = vmul.f32 %v2573_v43, %v2573_v43  ;;  %3928 = vmatprep.subr.bf16.mxu1 %v4277_v22 }
 0x5e9   : > { %v2580_v7 = vmul.f32 %v2576_v58, %v2562_v51  ;;  %v2577_v57 = vmul.f32 %v2565_v60, %v2565_v60  ;;  %3929 = vmatpush3.bf16.msra.mxu1 %v4277_v22 }
 0x5ea   : > { %v2586_v63 = vmul.f32 0.044715, %v2582_v61  ;;  %v2583_v0 = vmul.f32 %v2579_v47, %v2573_v43  ;;  %3930 = vmatprep.subr.bf16.mxu1 %v4278_v28 }
 0x5eb   : > { %v2584_v33 = vmul.f32 0.044715, %v2580_v7  ;;  %v2581_v1 = vmul.f32 %v2577_v57, %v2565_v60 }
 0x5ec   : > { %v2590_v2 = vadd.f32 %v2586_v63, %v2570_v40  ;;  %v2587_v4 = vmul.f32 0.044715, %v2583_v0 }
 0x5ed   : > { %v2588_v5 = vadd.f32 %v2584_v33, %v2562_v51  ;;  %v2585_v8 = vmul.f32 0.044715, %v2581_v1  ;;  %3931 = vmatpush3.bf16.msra.mxu1 %v4278_v28 }
 0x5ee   : > { %v2594_v18 = vmul.f32 0.7978846, %v2590_v2  ;;  %v2591_v19 = vadd.f32 %v2587_v4, %v2573_v43 }
 0x5ef   : > { %v2592_v38 = vmul.f32 0.7978846, %v2588_v5  ;;  %v2589_v36 = vadd.f32 %v2585_v8, %v2565_v60 }
 0x5f0   : > { %4321 = vtanh.f32 %v2594_v18  ;;  %v2595_v3 = vmul.f32 0.7978846, %v2591_v19 }
 0x5f1   : > { %4323 = vtanh.f32 %v2592_v38  ;;  %v2593_v49 = vmul.f32 0.7978846, %v2589_v36 }
 0x5f2   : > { %4325 = vtanh.f32 %v2595_v3 }
 0x5f3   : > { %4327 = vtanh.f32 %v2593_v49 }
 0x5fa   : > { %v4322_v9 = vpop.eup %4321 }
 0x5fb   : > { %v4324_v45 = vpop.eup %4323  ;;  %v2602_v55 = vadd.f32 1.0, %v4322_v9 }
 0x5fc   : > { %v4326_v10 = vpop.eup %4325  ;;  %v2600_v11 = vadd.f32 1.0, %v4324_v45 }
 0x5fd   : > { %v4328_v12 = vpop.eup %4327  ;;  %v2606_v53 = vmul.f32 0.5, %v2602_v55  ;;  %v2603_v24 = vadd.f32 1.0, %v4326_v10 }
 0x5fe   : > { %v2604_v25 = vmul.f32 0.5, %v2600_v11  ;;  %v2601_v35 = vadd.f32 1.0, %v4328_v12 }
 0x5ff   : > { %v2607_v32 = vmul.f32 0.5, %v2603_v24  ;;  %v2610_v17 = vmul.f32 %v2606_v53, %v2570_v40  ;;  %v4279_v40 = vld [vmem:[#allocation22 + $0x10] sm:$0xff]  }
 0x600   : > { %v2605_v34 = vmul.f32 0.5, %v2601_v35  ;;  %v2608_v20 = vmul.f32 %v2604_v25, %v2562_v51  ;;  %3932 = vmatprep.subr.bf16.mxu1 %v4279_v40  ;;  %v4281_v51 = vld [vmem:[#allocation25] sm:$0xff]  }
 0x601   : > { %v2611_v26 = vmul.f32 %v2607_v32, %v2573_v43  ;;  %3933 = vmatpush3.bf16.msra.mxu1 %v4279_v40 }
 0x602   : > { %v2609_v39 = vmul.f32 %v2605_v34, %v2565_v60  ;;  %3934 = vmatprep.subr.bf16.mxu1 %v4280_v46 }
 0x603   : > { %v2613_v30 = vpack.c.bf16 %v2611_v26, %v2610_v17 }
 0x604   : > { %v2612_v16 = vpack.c.bf16 %v2609_v39, %v2608_v20 }
 0x605   : > { %3935 = vmatpush3.bf16.msra.mxu1 %v4280_v46 }
 0x606   : > { %3924 = vmatprep.mubr.msk.bf16.mxu0 %vm6204_vm0, %v2612_v16  ;;  %3972 = vmatprep.subr.bf16.mxu1 %v4281_v51 }
 0x607   : > { %3925 = vmatmul.mubr.msk.bf16.vlgmr.msra.gmra.mrb[8].mxu0 %vm6215_vm1, %v2613_v30 }
 0x608   : > { %3941 = vmatpush3.bf16.msra.mxu0 %v4265_v23  ;;  %3948 = vmatprep.mubr.msk.bf16.mxu0 %vm6216_vm2, %v2858_v41  ;;  %v1938_v41 = vld [vmem:[%s5952_s29 + $0x8] sm:$0xff]  ;;  %v2841_v23 = vpack.c.bf16 %v1940_v29, %v1939_v56 }
 0x609   : > { %3942 = vmatprep.subr.bf16.mxu0 %v4266_v21  ;;  %v2840_v48 = vpack.c.bf16 %v1938_v41, %v1937_v52  ;;  %v4282_v41 = vld [vmem:[#allocation25 + $0x8] sm:$0xff]  }
 0x60c   : > { %3943 = vmatpush3.bf16.msra.mxu0 %v4266_v21 }
 0x60d   : > { %3944 = vmatprep.subr.bf16.mxu0 %v4267_v13 }
 0x610   : > { %3945 = vmatpush3.bf16.msra.mxu0 %v4267_v13 }
 0x611   : > { %3946 = vmatprep.subr.bf16.mxu0 %v4268_v31 }
 0x614   : > { %3947 = vmatpush3.bf16.msra.mxu0 %v4268_v31 }
 0x615   : > { %3952 = vmatprep.subr.bf16.mxu0 %v4269_v62 }
 0x617   : > { %3949 = vmatmul.mubr.msk.bf16.vlgmr.msra.gmra.mrb[12].mxu0 %vm6218_vm3, %v2859_v42  ;;  %v4275_v42 = vld [vmem:[%s6093_s19 + $0x30] sm:$0xff]  }
 0x618   : > { %3953 = vmatpush3.bf16.msra.mxu0 %v4269_v62  ;;  %3968 = vmatprep.mubr.bf16.mxu0 %v2840_v48  ;;  %v4283_v48 = vld [vmem:[#allocation25 + $0x10] sm:$0xff]  }
 0x619   : > { %3954 = vmatprep.subr.bf16.mxu0 %v4270_v44 }
 0x61c   : > { %3955 = vmatpush3.bf16.msra.mxu0 %v4270_v44  ;;  %v4284_v44 = vld [vmem:[#allocation25 + $0x18] sm:$0xff]  }
 0x61d   : > { %3956 = vmatprep.subr.bf16.mxu0 %v4271_v37 }
 0x620   : > { %3957 = vmatpush3.bf16.msra.mxu0 %v4271_v37  ;;  %v3743_v37 = vld [vmem:[%s6221_s23] ss:$0 sm:$0xff]  ;;  %s1038_s23 = scalar_lea.vmem [#allocation28], %s3630_s10 }
 0x621   : > { %3958 = vmatprep.subr.bf16.mxu0 %v4272_v14  ;;  %s3353_s12 = sshll.u32 %s1038_s23, 4  ;;  %s6024_s12 = int_to_ptr.vmem [resolvable:$true] %s3353_s12 }
 0x622   : > { %s4801_s16 = scalar_lea.vmem %s6024_s12, 512 }
 0x623   : > { %p4802_p12 = scmp.ne.s32.totalorder %s6024_s12, %s4801_s16 }
 0x624   : > { %3959 = vmatpush3.bf16.msra.mxu0 %v4272_v14 }
 0x625   : > { %3960 = vmatprep.subr.bf16.mxu0 %v4273_v27  ;;  %p4803_p8 = pnand %p4802_p12, %p6233_p7 }
 0x627   : > { %p4804_p11 = pneg %p4803_p8 }
 0x628   : > { %3961 = vmatpush3.bf16.msra.mxu0 %v4273_v27 }
 0x629   : > { %3962 = vmatprep.subr.bf16.mxu0 %v4274_v15 }
 0x62c   : > { %3963 = vmatpush3.bf16.msra.mxu0 %v4274_v15 }
 0x62d   : > { %3964 = vmatprep.subr.bf16.mxu0 %v4275_v42 }
 0x630   : > { %3965 = vmatpush3.bf16.msra.mxu0 %v4275_v42 }
 0x631   : > { %3966 = vmatprep.subr.bf16.mxu0 %v4276_v50 }
 0x634   : > { %3967 = vmatpush3.bf16.msra.mxu0 %v4276_v50 }
 0x637   : > { %3969 = vmatmul.mubr.bf16.vlgmr.msra.gmra.mrb[12].mxu0 %v2841_v23 }
 0x6da   : > { %v3926_v59 = vpop.f32.mrb[8].mxu0 }
 0x6db   : > { %v2702_v43 = vadd.f32 %v3926_v59, %v3715_v6  ;;  %v2693_v54 = vpop.f32.mrb[9].mxu0 }
 0x6dc   : > { %v2694_v58 = vadd.f32 %v3715_v6, %v2693_v54  ;;  %v3927_v60 = vpop.f32.mrb[10].mxu0 }
 0x6dd   : > { %v2710_v61 = vmul.f32 %v2702_v43, %v2702_v43  ;;  %v2705_v47 = vadd.f32 %v3927_v60, %v3715_v6  ;;  %v2696_v7 = vpop.f32.mrb[11].mxu0 }
 0x6de   : > { %v2708_v57 = vmul.f32 %v2694_v58, %v2694_v58  ;;  %v2697_v63 = vadd.f32 %v3715_v6, %v2696_v7 }
 0x6df   : > { %v2714_v0 = vmul.f32 %v2710_v61, %v2702_v43  ;;  %v2711_v33 = vmul.f32 %v2705_v47, %v2705_v47 }
 0x6e0   : > { %v2712_v1 = vmul.f32 %v2708_v57, %v2694_v58  ;;  %v2709_v2 = vmul.f32 %v2697_v63, %v2697_v63 }
 0x6e1   : > { %v2718_v4 = vmul.f32 0.044715, %v2714_v0  ;;  %v2715_v5 = vmul.f32 %v2711_v33, %v2705_v47 }
 0x6e2   : > { %v2716_v8 = vmul.f32 0.044715, %v2712_v1  ;;  %v2713_v18 = vmul.f32 %v2709_v2, %v2697_v63 }
 0x6e3   : > { %v2722_v19 = vadd.f32 %v2718_v4, %v2702_v43  ;;  %v2719_v38 = vmul.f32 0.044715, %v2715_v5 }
 0x6e4   : > { %v2720_v36 = vadd.f32 %v2716_v8, %v2694_v58  ;;  %v2717_v3 = vmul.f32 0.044715, %v2713_v18 }
 0x6e5   : > { %v2726_v49 = vmul.f32 0.7978846, %v2722_v19  ;;  %v2723_v9 = vadd.f32 %v2719_v38, %v2705_v47 }
 0x6e6   : > { %v2724_v45 = vmul.f32 0.7978846, %v2720_v36  ;;  %v2721_v55 = vadd.f32 %v2717_v3, %v2697_v63 }
 0x6e7   : > { %4329 = vtanh.f32 %v2726_v49  ;;  %v2727_v10 = vmul.f32 0.7978846, %v2723_v9 }
 0x6e8   : > { %4331 = vtanh.f32 %v2724_v45  ;;  %v2725_v11 = vmul.f32 0.7978846, %v2721_v55 }
 0x6e9   : > { %4333 = vtanh.f32 %v2727_v10 }
 0x6ea   : > { %4335 = vtanh.f32 %v2725_v11 }
 0x6f1   : > { %v4330_v12 = vpop.eup %4329 }
 0x6f2   : > { %v4332_v53 = vpop.eup %4331  ;;  %v2734_v24 = vadd.f32 1.0, %v4330_v12 }
 0x6f3   : > { %v4334_v25 = vpop.eup %4333  ;;  %v2732_v35 = vadd.f32 1.0, %v4332_v53 }
 0x6f4   : > { %v4336_v32 = vpop.eup %4335  ;;  %v2738_v34 = vmul.f32 0.5, %v2734_v24  ;;  %v2735_v17 = vadd.f32 1.0, %v4334_v25 }
 0x6f5   : > { %v2736_v26 = vmul.f32 0.5, %v2732_v35  ;;  %v2733_v20 = vadd.f32 1.0, %v4336_v32  ;;  %v4285_v35 = vld [vmem:[#allocation26] sm:$0xff]   ;;  %v4286_v32 = vld [vmem:[#allocation26 + $0x8] sm:$0xff]  }
 0x6f6   : > { %v2739_v39 = vmul.f32 0.5, %v2735_v17  ;;  %v2742_v16 = vmul.f32 %v2738_v34, %v2702_v43  ;;  %v4287_v34 = vld [vmem:[#allocation26 + $0x10] sm:$0xff]   ;;  %v4288_v17 = vld [vmem:[#allocation26 + $0x18] sm:$0xff]  }
 0x6f7   : > { %v2737_v30 = vmul.f32 0.5, %v2733_v20  ;;  %v2740_v13 = vmul.f32 %v2736_v26, %v2694_v58 }
 0x6f8   : > { %v2743_v21 = vmul.f32 %v2739_v39, %v2705_v47 }
 0x6f9   : > { %v2741_v31 = vmul.f32 %v2737_v30, %v2697_v63 }
 0x6fa   : > { %v2745_v62 = vpack.c.bf16 %v2743_v21, %v2742_v16  ;;  %v3744_v16 = vld [vmem:[%s6224_s3] ss:$0 sm:$0xff]  ;;  %s3767_s3 = sshll.u32 %s5085_s8, 9  ;;  %s6033_s8 = scalar_lea.sflag [#allocation4], %s1036_s28 }
 0x6fb   : > { %v2744_v52 = vpack.c.bf16 %v2741_v31, %v2740_v13 }
 0x6fd   : > { %3936 = vmatprep.mubr.msk.bf16.mxu1 %vm6219_vm10, %v2744_v52 }
 0x6fe   : > { %3937 = vmatmul.mubr.msk.bf16.vlgmr.msra.gmra.mrb[8].mxu1 %vm6220_vm11, %v2745_v62 }
 0x6ff   : > { %3973 = vmatpush3.bf16.msra.mxu1 %v4281_v51 }
 0x700   : > { %3974 = vmatprep.subr.bf16.mxu1 %v4282_v41 }
 0x703   : > { %3975 = vmatpush3.bf16.msra.mxu1 %v4282_v41 }
 0x704   : > { %3976 = vmatprep.subr.bf16.mxu1 %v4283_v48 }
 0x707   : > { %3977 = vmatpush3.bf16.msra.mxu1 %v4283_v48 }
 0x708   : > { %3978 = vmatprep.subr.bf16.mxu1 %v4284_v44 }
 0x70a   : > { %v3970_v14 = vpop.f32.mrb[12].mxu0 }
 0x70b   : > { %v3053_v27 = vadd.f32 %v3970_v14, %v3743_v37  ;;  %v3029_v15 = vpop.f32.mrb[13].mxu0  ;;  %3979 = vmatpush3.bf16.msra.mxu1 %v4284_v44 }
 0x70c   : > { %v3051_v42 = vadd.f32 %v3743_v37, %v3029_v15  ;;  %v3971_v50 = vpop.f32.mrb[14].mxu0  ;;  %3984 = vmatprep.subr.bf16.mxu1 %v4285_v35 }
 0x70d   : > { %v3057_v56 = vmul.f32 %v3053_v27, %v3053_v27  ;;  %v3054_v29 = vadd.f32 %v3971_v50, %v3743_v37  ;;  %v3032_v23 = vpop.f32.mrb[15].mxu0 }
 0x70e   : > { %v3055_v22 = vmul.f32 %v3051_v42, %v3051_v42  ;;  %v3052_v28 = vadd.f32 %v3743_v37, %v3032_v23 }
 0x70f   : > { %v3061_v40 = vmul.f32 %v3057_v56, %v3053_v27  ;;  %v3058_v46 = vmul.f32 %v3054_v29, %v3054_v29 }
 0x710   : > { %v3059_v51 = vmul.f32 %v3055_v22, %v3051_v42  ;;  %v3056_v6 = vmul.f32 %v3052_v28, %v3052_v28 }
 0x711   : > { %v3065_v59 = vmul.f32 0.044715, %v3061_v40  ;;  %v3062_v43 = vmul.f32 %v3058_v46, %v3054_v29 }
 0x712   : > { %v3063_v54 = vmul.f32 0.044715, %v3059_v51  ;;  %v3060_v58 = vmul.f32 %v3056_v6, %v3052_v28 }
 0x713   : > { %v3069_v60 = vadd.f32 %v3065_v59, %v3053_v27  ;;  %v3066_v61 = vmul.f32 0.044715, %v3062_v43 }
 0x714   : > { %v3067_v47 = vadd.f32 %v3063_v54, %v3051_v42  ;;  %v3064_v7 = vmul.f32 0.044715, %v3060_v58 }
 0x715   : > { %v3073_v57 = vmul.f32 0.7978846, %v3069_v60  ;;  %v3070_v63 = vadd.f32 %v3066_v61, %v3054_v29 }
 0x716   : > { %v3071_v0 = vmul.f32 0.7978846, %v3067_v47  ;;  %v3068_v33 = vadd.f32 %v3064_v7, %v3052_v28 }
 0x717   : > { %4337 = vtanh.f32 %v3073_v57  ;;  %v3074_v1 = vmul.f32 0.7978846, %v3070_v63 }
 0x718   : > { %4339 = vtanh.f32 %v3071_v0  ;;  %v3072_v2 = vmul.f32 0.7978846, %v3068_v33 }
 0x719   : > { %4341 = vtanh.f32 %v3074_v1 }
 0x71a   : > { %4343 = vtanh.f32 %v3072_v2 }
 0x721   : > { %v4338_v4 = vpop.eup %4337 }
 0x722   : > { %v4340_v5 = vpop.eup %4339  ;;  %v3081_v8 = vadd.f32 1.0, %v4338_v4 }
 0x723   : > { %v4342_v18 = vpop.eup %4341  ;;  %v3079_v19 = vadd.f32 1.0, %v4340_v5 }
 0x724   : > { %v4344_v38 = vpop.eup %4343  ;;  %v3085_v36 = vmul.f32 0.5, %v3081_v8  ;;  %v3082_v3 = vadd.f32 1.0, %v4342_v18 }
 0x725   : > { %v3083_v49 = vmul.f32 0.5, %v3079_v19  ;;  %v3080_v9 = vadd.f32 1.0, %v4344_v38 }
 0x726   : > { %v3086_v45 = vmul.f32 0.5, %v3082_v3  ;;  %v3089_v10 = vmul.f32 %v3085_v36, %v3053_v27 }
 0x727   : > { %v3084_v55 = vmul.f32 0.5, %v3080_v9  ;;  %v3087_v12 = vmul.f32 %v3083_v49, %v3051_v42  ;;  %v1943_v9 = vld [vmem:[%s1055_s27 + $0x10] sm:$0xff] }
 0x728   : > { %v3090_v11 = vmul.f32 %v3086_v45, %v3054_v29  ;;  %v3722_v45 = vld [vmem:[%s6229_s4] ss:$0 sm:$0xff]  ;;  %s4805_s4 = sshll.u32 %s4926_s2, 4  ;;  %s4806_s4 = int_to_ptr.vmem [resolvable:$false] %s4805_s4 }
 0x729   : > { %v3088_v53 = vmul.f32 %v3084_v55, %v3052_v28  ;;  %v1941_v55 = vld [vmem:[%s1055_s27] sm:$0xff]  ;;  %s4807_s14 = scalar_lea.vmem %s4806_s4, 1024  ;;  %p4808_p13 = scmp.lt.s32.totalorder %s6024_s12, %s4806_s4 }
 0x72a   : > { %v3092_v24 = vpack.c.bf16 %v3090_v11, %v3089_v10  ;;  %v1944_v10 = vld [vmem:[%s1055_s27 + $0x18] sm:$0xff]  ;;  %v3751_v11 = vld [vmem:[%s6230_s5] ss:$0 sm:$0xff]  ;;  %p4809_p1 = scmp.lt.s32.totalorder %s4807_s14, %s4801_s16 }
 0x72b   : > { %v3091_v25 = vpack.c.bf16 %v3088_v53, %v3087_v12  ;;  %v3673_v12 = vclamps-f32 %v1943_v9, 100.0 }
 0x72c   : > { %p4810_p6 = por %p4809_p1, %p4808_p13 }
 0x72d   : > { %3980 = vmatprep.mubr.msk.bf16.mxu1 %vm6222_vm5, %v3091_v25  ;;  %v3671_v25 = vclamps-f32 %v1941_v55, 100.0 }
 0x72e   : > { %3981 = vmatmul.mubr.msk.bf16.vlgmr.msra.gmra.mrb[12].mxu1 %vm6223_vm12, %v3092_v24  ;;  %v1942_v24 = vld [vmem:[%s1055_s27 + $0x8] sm:$0xff]  ;;  %s6029_s27 = scalar_lea.hbm %s6232_s9, %s3767_s3  ;;  %p4811_p9 = pnand %p4810_p6, %p4804_p11 }
 0x72f   : > { %3985 = vmatpush3.bf16.msra.mxu1 %v4285_v35 }
 0x730   : > { %3986 = vmatprep.subr.bf16.mxu1 %v4286_v32 }
 0x733   : > { %3987 = vmatpush3.bf16.msra.mxu1 %v4286_v32 }
 0x734   : > { %3988 = vmatprep.subr.bf16.mxu1 %v4287_v34 }
 0x737   : > { %3989 = vmatpush3.bf16.msra.mxu1 %v4287_v34  ;;  %v3674_v34 = vclamps-f32 %v1944_v10, 100.0 }
 0x738   : > { %3990 = vmatprep.subr.bf16.mxu1 %v4288_v17 }
 0x73b   : > { %3991 = vmatpush3.bf16.msra.mxu1 %v4288_v17 }
 0x7d1   : > { %v5993_v26 = vpop.f32.mrb[8].mxu1 }
 0x7d2   : > { %v5995_v20 = vpop.f32.mrb[9].mxu1  ;;  %v2834_v53 = vadd.f32 %v5993_v26, %v3722_v45 }
 0x7d3   : > { %v5997_v39 = vpop.f32.mrb[10].mxu1  ;;  %v2826_v35 = vadd.f32 %v3722_v45, %v5995_v20 }
 0x7d4   : > { %v5999_v30 = vpop.f32.mrb[11].mxu1  ;;  %v2837_v17 = vadd.f32 %v5997_v39, %v3722_v45 }
 0x801   : > { %v3982_v21 = vpop.f32.mrb[12].mxu1 }
 0x802   : > { %v3181_v13 = vadd.f32 %v3982_v21, %v3744_v16  ;;  %v3172_v31 = vpop.f32.mrb[13].mxu1 }
 0x803   : > { %v3173_v62 = vadd.f32 %v3744_v16, %v3172_v31  ;;  %v3983_v52 = vpop.f32.mrb[14].mxu1  ;;  %v2829_v31 = vadd.f32 %v3722_v45, %v5999_v30 }
 0x804   : > { %v3189_v41 = vmul.f32 %v3181_v13, %v3181_v13  ;;  %v3184_v48 = vadd.f32 %v3983_v52, %v3744_v16  ;;  %v3175_v44 = vpop.f32.mrb[15].mxu1 }
 0x805   : > { %v3187_v37 = vmul.f32 %v3173_v62, %v3173_v62  ;;  %v3176_v14 = vadd.f32 %v3744_v16, %v3175_v44 }
 0x806   : > { %v3193_v27 = vmul.f32 %v3189_v41, %v3181_v13  ;;  %v3190_v15 = vmul.f32 %v3184_v48, %v3184_v48  ;;  %v3329_v41 = vmul.f32 %v3673_v12, %v2834_v53 }
 0x807   : > { %v3191_v42 = vmul.f32 %v3187_v37, %v3173_v62  ;;  %v3188_v50 = vmul.f32 %v3176_v14, %v3176_v14  ;;  %v3327_v37 = vmul.f32 %v3671_v25, %v2826_v35 }
 0x808   : > { %v3197_v56 = vmul.f32 0.044715, %v3193_v27  ;;  %v3194_v29 = vmul.f32 %v3190_v15, %v3184_v48  ;;  %v3330_v27 = vmul.f32 %v3674_v34, %v2837_v17 }
 0x809   : > { %v3195_v23 = vmul.f32 0.044715, %v3191_v42  ;;  %v3192_v22 = vmul.f32 %v3188_v50, %v3176_v14 }
 0x80a   : > { %v3201_v28 = vadd.f32 %v3197_v56, %v3181_v13  ;;  %v3198_v40 = vmul.f32 0.044715, %v3194_v29 }
 0x80b   : > { %v3199_v46 = vadd.f32 %v3195_v23, %v3173_v62  ;;  %v3196_v51 = vmul.f32 0.044715, %v3192_v22 }
 0x80c   : > { %v3205_v6 = vmul.f32 0.7978846, %v3201_v28  ;;  %v3202_v59 = vadd.f32 %v3198_v40, %v3184_v48 }
 0x80d   : > { %v3203_v43 = vmul.f32 0.7978846, %v3199_v46  ;;  %v3200_v54 = vadd.f32 %v3196_v51, %v3176_v14 }
 0x80e   : > { %4345 = vtanh.f32 %v3205_v6  ;;  %v3206_v58 = vmul.f32 0.7978846, %v3202_v59 }
 0x80f   : > { %4347 = vtanh.f32 %v3203_v43  ;;  %v3204_v60 = vmul.f32 0.7978846, %v3200_v54 }
 0x810   : > { %4349 = vtanh.f32 %v3206_v58 }
 0x811   : > { %4351 = vtanh.f32 %v3204_v60 }
 0x818   : > { %v4346_v61 = vpop.eup %4345 }
 0x819   : > { %v4348_v47 = vpop.eup %4347  ;;  %v3213_v7 = vadd.f32 1.0, %v4346_v61 }
 0x81a   : > { %v4350_v57 = vpop.eup %4349  ;;  %v3211_v63 = vadd.f32 1.0, %v4348_v47 }
 0x81b   : > { %v4352_v0 = vpop.eup %4351  ;;  %v3217_v33 = vmul.f32 0.5, %v3213_v7  ;;  %v3214_v1 = vadd.f32 1.0, %v4350_v57 }
 0x81c   : > { %v3215_v2 = vmul.f32 0.5, %v3211_v63  ;;  %v3212_v4 = vadd.f32 1.0, %v4352_v0 }
 0x81d   : > { %v3218_v5 = vmul.f32 0.5, %v3214_v1  ;;  %v3221_v18 = vmul.f32 %v3217_v33, %v3181_v13  ;;  %v3672_v13 = vclamps-f32 %v1942_v24, 100.0 }
 0x81e   : > { %v3216_v8 = vmul.f32 0.5, %v3212_v4  ;;  %v3219_v38 = vmul.f32 %v3215_v2, %v3173_v62 }
 0x81f   : > { %v3222_v19 = vmul.f32 %v3218_v5, %v3184_v48  ;;  %v3328_v42 = vmul.f32 %v3672_v13, %v2829_v31 }
 0x820   : > { %v3220_v36 = vmul.f32 %v3216_v8, %v3176_v14 }
 0x821   : > { %v3224_v3 = vpack.c.bf16 %v3222_v19, %v3221_v18 }
 0x822   : > { %v3223_v49 = vpack.c.bf16 %v3220_v36, %v3219_v38 }
 0x824   : > { %3992 = vmatprep.mubr.msk.bf16.mxu1 %vm6226_vm6, %v3223_v49 }
 0x825   : > { %3993 = vmatmul.mubr.msk.bf16.vlgmr.msra.gmra.mrb[16].mxu1 %vm6227_vm9, %v3224_v3 }
 0x8f8   : > { %v3994_v32 = vpop.f32.mrb[16].mxu1 }
 0x8f9   : > { %v3313_v16 = vadd.f32 %v3994_v32, %v3751_v11  ;;  %v3304_v21 = vpop.f32.mrb[17].mxu1 }
 0x8fa   : > { %v3305_v62 = vadd.f32 %v3751_v11, %v3304_v21  ;;  %v3995_v52 = vpop.f32.mrb[18].mxu1 }
 0x8fb   : > { %v3760_v26 = vclamps-f32 %v3313_v16, 10000.0  ;;  %v3316_v48 = vadd.f32 %v3995_v52, %v3751_v11  ;;  %v3307_v44 = vpop.f32.mrb[19].mxu1 }
 0x8fc   : > { %v3758_v20 = vclamps-f32 %v3305_v62, 10000.0  ;;  %v3308_v14 = vadd.f32 %v3751_v11, %v3307_v44 }
 0x8fd   : > { %v3333_v39 = vadd.f32 %v3760_v26, %v3329_v41  ;;  %v3761_v15 = vclamps-f32 %v3316_v48, 10000.0 }
 0x8fe   : > { %v3331_v50 = vadd.f32 %v3758_v20, %v3327_v37  ;;  %v3759_v30 = vclamps-f32 %v3308_v14, 10000.0 }
 0x8ff   : > { %3337 = vst [vmem:[%s1038_s23 + $0x10] sm:$0xff] %v3333_v39  ;;  %v3334_v56 = vadd.f32 %v3761_v15, %v3330_v27 }
 0x900   : > { %3335 = vst [vmem:[%s1038_s23] sm:$0xff] %v3331_v50  ;;  %v3332_v29 = vadd.f32 %v3759_v30, %v3328_v42 }
 0x901   : > { %3338 = vst [vmem:[%s1038_s23 + $0x18] sm:$0xff] %v3334_v56 }
 0x902   : > { %3336 = vst [vmem:[%s1038_s23 + $0x8] sm:$0xff] %v3332_v29 }
 0x903   : > { %4814 = shalt.err (!%p4811_p9)
}
 0x904   : > { %s4815_s1 = scalar_lea.hbm %s6029_s27, 512  ;;  %s4819_s5 = scalar_lea.hbm %s6232_s9, 1536 }
 0x905   : > { %p4816_p5 = scmp.ne.s32.totalorder %s6029_s27, %s4815_s1  ;;  %p4820_p2 = scmp.lt.u32.totalorder %s6029_s27, %s6232_s9 }
 0x906   : > { %p4821_p3 = scmp.lt.u32.totalorder %s4819_s5, %s4815_s1  ;;  %p4823_p12 = scmp.lt.u32.totalorder %s4815_s1, %s6029_s27 }
 0x907   : > { %p4817_p0 = pnand %p4816_p5, %p6233_p7 }
 0x908   : > { %p4822_p4 = por %p4821_p3, %p4820_p2 }
 0x909   : > { %p4818_p10 = pneg %p4817_p0 }
 0x90a   : > { %p4824_p8 = por %p4823_p12, %p4822_p4 }
 0x90c   : > { %p4825_p11 = pnand %p4824_p8, %p4818_p10 }
 0x90e   : > { %4828 = shalt.err (!%p4825_p11)
}
 0x90f   : > { %s4927_s3 = smov 128   ;;  %s4928_s21 = smov 8  }
 0x910   : > { %4088 = dma.vmem_to_hbm [thread:$0]  (%p6233_p7), %s6024_s12, 512, %s6029_s27, %s6033_s8, %s4927_s3, %s4927_s3, %s4928_s21  }
 0x911 PF: > { %s6234_s6 = sld [smem:[#allocation42_spill]]  ;;  %s6235_s16 = sld [smem:[#allocation39_spill]] }
 0x912   : > { %s6236_s2 = sld [smem:[#allocation46_spill]] }
 0x917   : > { %p4175_p13 = scmp.ge.s32.totalorder %s6234_s6, 2  ;;  %s3368_s4 = sand.u32 1, %s6235_s16  }
 0x918   : > { %p6237_p1 = scmp.ne.s32.totalorder %s6236_s2, 0  ;;  %s3369_s14 = scalar_lea.sflag [#allocation4], %s3368_s4 }
 0x91a   : > { %p4140_p6 = pnand %p4175_p13, %p6237_p1 }
 0x91c   : > { %4882 = dma.done.wait (!%p4140_p6), %s3369_s14, 512  }
 0x91d   : > { %4884 = vsyncadd (!%p4140_p6), %s3369_s14, 4294966784  ;;  %s6238_s28 = sld [smem:[#allocation43_spill]]  ;;  %s6239_s27 = sld [smem:[#allocation40_spill]] }
 0x91e   : > { %s6240_s3 = sld [smem:[#allocation41_spill]]  ;;  %s6241_s7 = sld [smem:[#allocation44_spill]] }
 0x923   : > { %p45_p9 = scmp.ge.s32.totalorder %s6238_s28, 5  }
 0x925   :  { %47 = sbr.rel (!%p45_p9) target bundleno = 32 (0x20), region = 230 }
 0x92c   :  { %3374 = vsyncpa [#allocation3], 1 }
 0x92d   :  { %3376 = vsyncpa [#allocation3 + $0x1], 1 }
 0x92e   :  { %3377 = vsyncpa [#allocation6], 1 }
 0x92f   :  { %3378 = vsyncpa [#allocation9], 1 }
 0x930   :  { %3379 = vsyncpa [#allocation12], 1 }
 0x931   :  { %3380 = vsyncpa [#allocation15], 1 }
 0x932   :  { %3381 = vsyncpa [#allocation18], 1 }
 0x933   :  { %3382 = vsyncpa [#allocation21], 1 }
 0x934   :  { %3383 = vsyncpa [#allocation24], 1 }
 0x935   :  { %3384 = vsyncpa [#allocation27], 1 }
 0x936   :  { %3385 = vsyncpa [#allocation4], 1 }
 0x937   :  { %3387 = vsyncpa [#allocation4 + $0x1], 1 }

</bundles_post_ra>
